<compile_context>
chip_gen: v5e
topology: v5e:2x2
jax: 0.10.0
libtpu: 0.0.40
codegen_flags: <defaults>
</compile_context>

<pallas_src>
import jax
import jax.numpy as jnp
from jax.experimental import pallas as pl
from jax.experimental.pallas import tpu as pltpu


# ----------------------------------------------------------------------------
# small helpers
# ----------------------------------------------------------------------------
def _bspec(shape, index_map, *, single=False):
    """BlockSpec; grid-invariant blocks may request single buffering."""
    if single:
        return pl.BlockSpec(shape, index_map, pipeline_mode=pl.Buffered(1))
    return pl.BlockSpec(shape, index_map)


def _padded_bytes(shape, dtype):
    """Rough VMEM footprint of one buffer ((8,128)-tile padded)."""
    s = [d for d in shape if d is not None]
    if len(s) >= 1:
        s[-1] = -(-s[-1] // 128) * 128
    if len(s) >= 2:
        s[-2] = -(-s[-2] // 8) * 8
    n = 1
    for d in s:
        n *= d
    return n * jnp.dtype(dtype).itemsize


def _vmem_limit(entries):
    """entries: (shape, dtype, n_buffers). Returns a clamped scoped-VMEM budget."""
    est = sum(_padded_bytes(s, d) * n for (s, d, n) in entries)
    est = int(est * 1.5) + (2 << 20)            # margin for compiler temporaries
    return int(min(max(est, 32 << 20), 128 << 20))


# ----------------------------------------------------------------------------
# Kernel A: projector trunk  Linear -> BN(train) -> ReLU   (w1 streamed over H)
# ----------------------------------------------------------------------------
def _make_trunk_kernel(B_true):
    inv_b = 1.0 / float(B_true)

    def kernel(bmask_ref, x_ref, w1_ref, b1_ref, g_ref, bt_ref, hr_ref):
        m = bmask_ref[...]                                      # (Bp,1) {0,1}
        h = jnp.dot(x_ref[...], w1_ref[...],
                    preferred_element_type=jnp.float32) + b1_ref[...]
        # BN training statistics over the *real* rows only; centered two-pass
        # variance avoids the s2/B - mu^2 cancellation.
        mu = jnp.sum(h * m, axis=0, keepdims=True) * inv_b
        hc = (h - mu) * m
        var = jnp.sum(hc * hc, axis=0, keepdims=True) * inv_b
        hn = (h - mu) * jax.lax.rsqrt(var + 1e-5) * g_ref[...] + bt_ref[...]
        # ReLU, then zero padded rows so every downstream sum ignores them.
        hr_ref[...] = (jnp.maximum(hn, 0.0) * m).astype(hr_ref.dtype)

    return kernel


def _trunk(x, bmask, w1, b1, gamma, beta, B_true, TH, hr_dtype, single_buffer):
    Bp, D = x.shape
    H = w1.shape[1]
    nb = 1 if single_buffer else 2
    full = lambda j: (0, 0)
    col = lambda j: (0, j)
    vmem = _vmem_limit([
        ((Bp, D), x.dtype, nb),
        ((Bp, 1), jnp.float32, nb),
        ((D, TH), w1.dtype, 2),
        ((1, TH), jnp.float32, 6),
        ((Bp, TH), hr_dtype, 2),
        ((Bp, TH), jnp.float32, 3),          # f32 body intermediates
    ])
    return pl.pallas_call(
        _make_trunk_kernel(B_true),
        out_shape=jax.ShapeDtypeStruct((Bp, H), hr_dtype),
        grid=(H // TH,),
        in_specs=[
            _bspec((Bp, 1), full, single=single_buffer),   # batch-valid mask
            _bspec((Bp, D), full, single=single_buffer),   # x (bf16, resident)
            pl.BlockSpec((D, TH), col),                    # w1 (streamed)
            pl.BlockSpec((1, TH), col),                    # b1
            pl.BlockSpec((1, TH), col),                    # gamma
            pl.BlockSpec((1, TH), col),                    # beta
        ],
        out_specs=pl.BlockSpec((Bp, TH), col),
        compiler_params=pltpu.CompilerParams(
            dimension_semantics=("parallel",),
            vmem_limit_bytes=vmem),
    )(bmask, x, w1, b1, gamma, beta)


# ----------------------------------------------------------------------------
# Kernel B: second Linear (both branches) + VICReg statistics
# ----------------------------------------------------------------------------
def _make_loss_kernel(U):
    Uf = float(U)

    def kernel(umask_ref, hra_ref, hri_ref, w2a_ref, w2i_ref,
               gx_ref, gy_ref, part_ref,
               simv, stdxv, stdyv, dgxv, dgyv):
        k = pl.program_id(1)

        @pl.when(k == 0)
        def _init():
            gx_ref[...] = jnp.zeros_like(gx_ref)
            gy_ref[...] = jnp.zeros_like(gy_ref)
            part_ref[...] = jnp.zeros_like(part_ref)
            simv[...] = jnp.zeros_like(simv)
            stdxv[...] = jnp.zeros_like(stdxv)
            stdyv[...] = jnp.zeros_like(stdyv)
            dgxv[...] = jnp.zeros_like(dgxv)
            dgyv[...] = jnp.zeros_like(dgyv)

        m = umask_ref[...]                                      # (Bp,1) {0,1}
        xp = jnp.dot(hra_ref[...], w2a_ref[...],
                     preferred_element_type=jnp.float32)        # (Bp,TF) f32
        yp = jnp.dot(hri_ref[...], w2i_ref[...],
                     preferred_element_type=jnp.float32)

        d = xp - yp                         # padded rows are exactly 0 on both
        simv[...] += jnp.sum(d * d, axis=0, keepdims=True)

        def branch(p, g_ref, stdv, dgv):
            mean_u = jnp.sum(p * m, axis=0, keepdims=True) * (1.0 / Uf)
            pc = (p - mean_u) * m                       # non-unique rows -> 0
            ss = jnp.sum(pc * pc, axis=0, keepdims=True)
            std = jnp.sqrt(ss * (1.0 / (Uf - 1.0)) + 1e-4)
            stdv[...] += jnp.maximum(1.0 - std, 0.0)
            dgv[...] += ss * ss                         # diag(cov)^2 * (B-1)^2
            # Gram trick: ||pc^T pc||_F^2 == ||pc pc^T||_F^2 -> accumulate the
            # (Bp,Bp) Gram with an MXU contraction over the lane axis.
            g_ref[...] += jax.lax.dot_general(
                pc, pc, dimension_numbers=(((1,), (1,)), ((), ())),
                preferred_element_type=jnp.float32)

        branch(xp, gx_ref, stdxv, dgxv)
        branch(yp, gy_ref, stdyv, dgyv)

        @pl.when(k == pl.num_programs(1) - 1)
        def _finalize():
            vals = (jnp.sum(simv[...]), jnp.sum(stdxv[...]), jnp.sum(stdyv[...]),
                    jnp.sum(dgxv[...]), jnp.sum(dgyv[...]))
            lane = jax.lax.broadcasted_iota(jnp.int32, (1, 128), 1)
            packed = jnp.zeros((1, 128), jnp.float32)
            for idx, v in enumerate(vals):
                packed = jnp.where(lane == idx, v, packed)
            part_ref[...] = packed           # lane-dense partial scalars, row c

    return kernel


def _loss(hr_a, hr_i, umask, w2a, w2i, U, NC, TF, single_buffer):
    Bp, H = hr_a.shape
    F_out = w2a.shape[1]
    KPC = (F_out // NC) // TF                   # feature blocks per core split
    nb = 1 if single_buffer else 2
    inv = lambda c, k: (0, 0)
    w2_map = lambda c, k: (0, c * KPC + k)
    vmem = _vmem_limit([
        ((Bp, 1), jnp.float32, nb),
        ((Bp, H), hr_a.dtype, nb * 2),
        ((H, TF), w2a.dtype, 2 * 2),
        ((Bp, Bp), jnp.float32, nb * 2),
        ((1, 128), jnp.float32, 2),
        ((1, TF), jnp.float32, 5),
        ((Bp, TF), jnp.float32, 4),             # xp / yp / pc temporaries
    ])
    return pl.pallas_call(
        _make_loss_kernel(U),
        out_shape=(
            jax.ShapeDtypeStruct((NC, Bp, Bp), jnp.float32),   # partial Gram x
            jax.ShapeDtypeStruct((NC, Bp, Bp), jnp.float32),   # partial Gram y
            jax.ShapeDtypeStruct((NC, 128), jnp.float32),      # partial scalars
        ),
        grid=(NC, KPC),
        in_specs=[
            _bspec((Bp, 1), inv, single=single_buffer),        # unique-row mask
            _bspec((Bp, H), inv, single=single_buffer),        # hr_a (resident)
            _bspec((Bp, H), inv, single=single_buffer),        # hr_i (resident)
            pl.BlockSpec((H, TF), w2_map),                     # w2_a (streamed)
            pl.BlockSpec((H, TF), w2_map),                     # w2_i (streamed)
        ],
        out_specs=(
            _bspec((None, Bp, Bp), lambda c, k: (c, 0, 0), single=single_buffer),
            _bspec((None, Bp, Bp), lambda c, k: (c, 0, 0), single=single_buffer),
            pl.BlockSpec((1, 128), lambda c, k: (c, 0)),
        ),
        scratch_shapes=[pltpu.VMEM((1, TF), jnp.float32) for _ in range(5)],
        compiler_params=pltpu.CompilerParams(
            dimension_semantics=("parallel", "arbitrary"),
            vmem_limit_bytes=vmem),
    )(umask, hr_a, hr_i, w2a, w2i)


# ----------------------------------------------------------------------------
# Wrapper
# ----------------------------------------------------------------------------
def vicreg_forward(x, y, ids, params_a, params_i, num_features, pos="coarse",
                   matmul_dtype=jnp.bfloat16, hr_dtype=jnp.bfloat16,
                   block_f=None, block_h=None, num_core_splits=2,
                   pad_batch_multiple=128):
    B, D = x.shape
    H = params_a["w1"].shape[1]
    F_out = params_a["w2"].shape[1]
    assert F_out == num_features, "projector output width must equal num_features"
    assert params_i["w1"].shape == (D, H) and params_i["w2"].shape == (H, F_out)

    # ---- batch padding to the MXU/sublane tile; padded rows masked to 0 -----
    mult = max(int(pad_batch_multiple), 8)
    Bp = -(-B // mult) * mult
    Bp = -(-Bp // 8) * 8
    pad = Bp - B
    xb = jnp.pad(x, ((0, pad), (0, 0))).astype(matmul_dtype)   # bf16 in wrapper
    yb = jnp.pad(y, ((0, pad), (0, 0))).astype(matmul_dtype)
    bmask = (jnp.arange(Bp) < B).astype(jnp.float32).reshape(Bp, 1)

    # ---- static python dedup of ids (exactly as the torch module) -----------
    seen, unique_index = set(), []
    for i, img_id in enumerate(ids):
        if img_id not in seen:
            seen.add(img_id)
            unique_index.append(i)
    U = len(unique_index)
    umask = jnp.zeros((Bp, 1), jnp.float32).at[jnp.array(unique_index), 0].set(1.0)

    # ---- tile selection ------------------------------------------------------
    TH = block_h
    if TH is None:
        for cand in (512, 256, 128):
            if H % cand == 0:
                TH = cand
                break
        else:
            TH = H                       # tiny / unaligned hidden width
    assert H % TH == 0

    NC = max(int(num_core_splits), 1)
    while NC > 1 and F_out % NC != 0:
        NC -= 1
    TF = block_f
    if TF is None:
        Fpc = F_out // NC
        for cand in (512, 256, 128):
            # keep the streamed (double-buffered, 2-branch) w2 tiles modest
            if Fpc % cand == 0 and 4 * H * cand * 2 <= (24 << 20):
                TF = cand
                break
        if TF is None:
            for cand in (512, 256, 128):
                if Fpc % cand == 0:
                    TF = cand
                    break
        if TF is None:
            NC, TF = 1, F_out            # unaligned width: one block, no split
    if NC > 1 and (F_out // NC) % TF != 0:
        NC = 1
    assert F_out % (NC * TF) == 0, "feature dim must tile by NC * TF"

    # ---- weights in the MXU-fast dtype; biases / BN params stay f32 ---------
    w1a = params_a["w1"].astype(matmul_dtype)
    w2a = params_a["w2"].astype(matmul_dtype)
    w1i = params_i["w1"].astype(matmul_dtype)
    w2i = params_i["w2"].astype(matmul_dtype)

    def run(single_buffer):
        hr_a = _trunk(xb, bmask, w1a, params_a["b1"], params_a["gamma"],
                      params_a["beta"], B, TH, hr_dtype, single_buffer)
        hr_i = _trunk(yb, bmask, w1i, params_i["b1"], params_i["gamma"],
                      params_i["beta"], B, TH, hr_dtype, single_buffer)
        # TODO(synk): for very large B*H, stream hr in batch-row blocks instead
        # of holding both branches resident in VMEM.
        return _loss(hr_a, hr_i, umask, w2a, w2i, U, NC, TF, single_buffer)

    try:
        gx, gy, partials = run(True)
    except Exception:
        # pipeline_mode=pl.Buffered(1) not supported on this JAX/Mosaic build;
        # fall back to default double-buffering (correctness unchanged).
        gx, gy, partials = run(False)

    # ---- tiny combine in plain JAX (needed because sum(G^2) is not additive
    #      across the per-core partial Grams) ---------------------------------
    Bf, Ff = float(B), float(F_out)
    Gx = jnp.sum(gx, axis=0)
    Gy = jnp.sum(gy, axis=0)
    sim_ss, stdx_s, stdy_s, dgx, dgy = (partials[:, i].sum() for i in range(5))
    sim = sim_ss / (Bf * Ff)
    std = (stdx_s + stdy_s) * 0.5 / Ff
    inv_bm1_sq = 1.0 / ((Bf - 1.0) ** 2)          # torch uses the ORIGINAL B
    off_x = (jnp.sum(Gx * Gx) - dgx) * inv_bm1_sq
    off_y = (jnp.sum(Gy * Gy) - dgy) * inv_bm1_sq
    cov = (off_x + off_y) / Ff
    return {f"{pos}_sim_loss": sim, f"{pos}_std_loss": std, f"{pos}_cov_loss": cov}


# ----------------------------------------------------------------------------
# Parameter init + pure-JAX reference (sanity check only)
# ----------------------------------------------------------------------------
def init_projector_params(key, d_in, hidden, d_out):
    k1, k2 = jax.random.split(key)
    return {
        "w1": jax.random.normal(k1, (d_in, hidden), jnp.float32) / jnp.sqrt(d_in),
        "b1": jnp.zeros((1, hidden), jnp.float32),
        "gamma": jnp.ones((1, hidden), jnp.float32),
        "beta": jnp.zeros((1, hidden), jnp.float32),
        "w2": jax.random.normal(k2, (hidden, d_out), jnp.float32) / jnp.sqrt(hidden),
    }


def reference_vicreg(x, y, ids, pa, pi, num_features):
    """Pure-JAX f32 mirror of the PyTorch forward (for the sanity check)."""
    def proj(z, p):
        h = z @ p["w1"] + p["b1"]
        mu = jnp.mean(h, axis=0, keepdims=True)
        var = jnp.mean((h - mu) ** 2, axis=0, keepdims=True)
        hn = (h - mu) / jnp.sqrt(var + 1e-5) * p["gamma"] + p["beta"]
        return jnp.maximum(hn, 0.0) @ p["w2"]

    B = x.shape[0]
    xp, yp = proj(x, pa), proj(y, pi)
    sim = jnp.mean((xp - yp) ** 2)
    seen, uidx = set(), []
    for i, t in enumerate(ids):
        if t not in seen:
            seen.add(t)
            uidx.append(i)
    xu = xp[jnp.array(uidx)] - xp[jnp.array(uidx)].mean(axis=0)
    yu = yp[jnp.array(uidx)] - yp[jnp.array(uidx)].mean(axis=0)
    std_x = jnp.sqrt(jnp.var(xu, axis=0, ddof=1) + 1e-4)
    std_y = jnp.sqrt(jnp.var(yu, axis=0, ddof=1) + 1e-4)
    std = (jnp.mean(jnp.maximum(1.0 - std_x, 0.0)) / 2.0
           + jnp.mean(jnp.maximum(1.0 - std_y, 0.0)) / 2.0)
    cov_x = xu.T @ xu / (B - 1)       # torch divides by the *original* batch size
    cov_y = yu.T @ yu / (B - 1)
    off = lambda c: jnp.sum(c * c) - jnp.sum(jnp.diag(c) ** 2)
    cov = off(cov_x) / num_features + off(cov_y) / num_features
    return jnp.stack([sim, std, cov])


if __name__ == "__main__":
    # small deterministic setup: args.projector_mlp = "256-512"
    B, D_IN, HIDDEN, N_FEAT = 8, 64, 256, 512
    key = jax.random.PRNGKey(0)
    kx, ky, kpa, kpi = jax.random.split(key, 4)

    x = jax.random.normal(kx, (B, D_IN), jnp.float32)
    y = jax.random.normal(ky, (B, D_IN), jnp.float32)
    ids = [0, 1, 2, 0, 3, 1, 4, 5]            # duplicates -> 6 unique rows

    # args.same_projector = False -> two independent projectors
    params_a = init_projector_params(kpa, D_IN, HIDDEN, N_FEAT)
    params_i = init_projector_params(kpi, D_IN, HIDDEN, N_FEAT)

    # block_h=128 -> 2-step trunk grid (exercises the streamed-w1 path);
    # block_f=128 + num_core_splits=2 -> (2,2) loss grid (core split + feature
    # accumulation both exercised).
    losses = vicreg_forward(x, y, ids, params_a, params_i, N_FEAT, pos="coarse",
                            matmul_dtype=jnp.bfloat16, block_f=128, block_h=128,
                            num_core_splits=2, pad_batch_multiple=128)
    losses = jax.block_until_ready(losses)

    got = jnp.stack([losses["coarse_sim_loss"],
                     losses["coarse_std_loss"],
                     losses["coarse_cov_loss"]])
    ref = reference_vicreg(x, y, ids, params_a, params_i, N_FEAT)
    # loose tolerance: kernel runs the two matmuls with bf16 MXU inputs
    if bool(jnp.allclose(got, ref, rtol=2e-1, atol=5e-2)):
        print("KERNEL_OK")
    else:
        print("MISMATCH", got, ref)
</pallas_src>

<mosaic_0001>
module attributes {stable_mosaic.version = 11 : i64} {
  func.func @kernel(%arg0: i32, %arg1: memref<128x1xf32, #tpu.memory_space<vmem>>, %arg2: memref<128x64xbf16, #tpu.memory_space<vmem>>, %arg3: memref<64x128xbf16, #tpu.memory_space<vmem>>, %arg4: memref<1x128xf32, #tpu.memory_space<vmem>>, %arg5: memref<1x128xf32, #tpu.memory_space<vmem>>, %arg6: memref<1x128xf32, #tpu.memory_space<vmem>>, %arg7: memref<128x128xbf16, #tpu.memory_space<vmem>>) attributes {dimension_semantics = [#tpu.dimension_semantics<parallel>], iteration_bounds = array<i64: 2>, scalar_prefetch = 0 : i64, scratch_operands = 0 : i64, tpu.core_type = #tpu.core_type<tc>, window_params = [{pipeline_mode = #tpu.pipeline_mode<synchronous>, transform_indices = @transform_0, window_bounds = array<i64: 128, 1>}, {pipeline_mode = #tpu.pipeline_mode<synchronous>, transform_indices = @transform_1, window_bounds = array<i64: 128, 64>}, {transform_indices = @transform_2, window_bounds = array<i64: 64, 128>}, {transform_indices = @transform_3, window_bounds = array<i64: 1, 128>}, {transform_indices = @transform_4, window_bounds = array<i64: 1, 128>}, {transform_indices = @transform_5, window_bounds = array<i64: 1, 128>}, {transform_indices = @transform_6, window_bounds = array<i64: 128, 128>}]} {
    %c0 = arith.constant 0 : index
    %c0_0 = arith.constant 0 : index
    %0 = vector.load %arg1[%c0, %c0_0] : memref<128x1xf32, #tpu.memory_space<vmem>>, vector<128x1xf32>
    %c0_1 = arith.constant 0 : index
    %c0_2 = arith.constant 0 : index
    %1 = vector.load %arg2[%c0_1, %c0_2] : memref<128x64xbf16, #tpu.memory_space<vmem>>, vector<128x64xbf16>
    %c0_3 = arith.constant 0 : index
    %c0_4 = arith.constant 0 : index
    %2 = vector.load %arg3[%c0_3, %c0_4] : memref<64x128xbf16, #tpu.memory_space<vmem>>, vector<64x128xbf16>
    %cst = arith.constant dense<0.000000e+00> : vector<128x128xf32>
    %3 = tpu.matmul %1, %2, %cst {dimension_numbers = #tpu.dot_dimension_numbers<[1], [0], [0], [1], [0, 0, 1, 1], [], []>} : vector<128x64xbf16>, vector<64x128xbf16>, vector<128x128xf32> -> vector<128x128xf32>
    %c0_5 = arith.constant 0 : index
    %c0_6 = arith.constant 0 : index
    %4 = vector.load %arg4[%c0_5, %c0_6] : memref<1x128xf32, #tpu.memory_space<vmem>>, vector<1x128xf32>
    %5 = vector.broadcast %4 : vector<1x128xf32> to vector<128x128xf32>
    %6 = arith.addf %3, %5 : vector<128x128xf32>
    %7 = vector.broadcast %0 : vector<128x1xf32> to vector<128x128xf32>
    %8 = arith.mulf %6, %7 : vector<128x128xf32>
    %cst_7 = arith.constant dense<0.000000e+00> : vector<128xf32>
    %9 = vector.multi_reduction <add>, %8, %cst_7 [0] : vector<128x128xf32> to vector<128xf32>
    %10 = vector.shape_cast %9 : vector<128xf32> to vector<1x128xf32>
    %cst_8 = arith.constant 1.250000e-01 : f32
    %11 = vector.broadcast %cst_8 : f32 to vector<1x128xf32>
    %12 = arith.mulf %10, %11 : vector<1x128xf32>
    %13 = vector.broadcast %12 : vector<1x128xf32> to vector<128x128xf32>
    %14 = arith.subf %6, %13 : vector<128x128xf32>
    %15 = vector.broadcast %0 : vector<128x1xf32> to vector<128x128xf32>
    %16 = arith.mulf %14, %15 : vector<128x128xf32>
    %17 = arith.mulf %16, %16 : vector<128x128xf32>
    %cst_9 = arith.constant dense<0.000000e+00> : vector<128xf32>
    %18 = vector.multi_reduction <add>, %17, %cst_9 [0] : vector<128x128xf32> to vector<128xf32>
    %19 = vector.shape_cast %18 : vector<128xf32> to vector<1x128xf32>
    %cst_10 = arith.constant 1.250000e-01 : f32
    %20 = vector.broadcast %cst_10 : f32 to vector<1x128xf32>
    %21 = arith.mulf %19, %20 : vector<1x128xf32>
    %22 = vector.broadcast %12 : vector<1x128xf32> to vector<128x128xf32>
    %23 = arith.subf %6, %22 : vector<128x128xf32>
    %cst_11 = arith.constant 9.99999974E-6 : f32
    %24 = vector.broadcast %cst_11 : f32 to vector<1x128xf32>
    %25 = arith.addf %21, %24 : vector<1x128xf32>
    %26 = math.rsqrt %25 : vector<1x128xf32>
    %27 = vector.broadcast %26 : vector<1x128xf32> to vector<128x128xf32>
    %28 = arith.mulf %23, %27 : vector<128x128xf32>
    %c0_12 = arith.constant 0 : index
    %c0_13 = arith.constant 0 : index
    %29 = vector.load %arg5[%c0_12, %c0_13] : memref<1x128xf32, #tpu.memory_space<vmem>>, vector<1x128xf32>
    %30 = vector.broadcast %29 : vector<1x128xf32> to vector<128x128xf32>
    %31 = arith.mulf %28, %30 : vector<128x128xf32>
    %c0_14 = arith.constant 0 : index
    %c0_15 = arith.constant 0 : index
    %32 = vector.load %arg6[%c0_14, %c0_15] : memref<1x128xf32, #tpu.memory_space<vmem>>, vector<1x128xf32>
    %33 = vector.broadcast %32 : vector<1x128xf32> to vector<128x128xf32>
    %34 = arith.addf %31, %33 : vector<128x128xf32>
    %cst_16 = arith.constant 0.000000e+00 : f32
    %35 = vector.broadcast %cst_16 : f32 to vector<128x128xf32>
    %36 = arith.maximumf %34, %35 : vector<128x128xf32>
    %37 = vector.broadcast %0 : vector<128x1xf32> to vector<128x128xf32>
    %38 = arith.mulf %36, %37 : vector<128x128xf32>
    %39 = arith.truncf %38 : vector<128x128xf32> to vector<128x128xbf16>
    %c0_17 = arith.constant 0 : index
    %c0_18 = arith.constant 0 : index
    %40 = vector.load %arg7[%c0_17, %c0_18] : memref<128x128xbf16, #tpu.memory_space<vmem>>, vector<128x128xbf16>
    tpu.vector_store %arg7[%c0_17, %c0_18], %39 {strides = array<i32>} : memref<128x128xbf16, #tpu.memory_space<vmem>>, vector<128x128xbf16>,
    return
  }
  func.func @transform_0(%arg0: i32) -> (i32, i32) {
    %c0_i32 = arith.constant 0 : i32
    %c0_i32_0 = arith.constant 0 : i32
    %c0_i32_1 = arith.constant 0 : i32
    return %c0_i32, %c0_i32_0 : i32, i32
  }
  func.func @transform_1(%arg0: i32) -> (i32, i32) {
    %c0_i32 = arith.constant 0 : i32
    %c0_i32_0 = arith.constant 0 : i32
    %c0_i32_1 = arith.constant 0 : i32
    return %c0_i32, %c0_i32_0 : i32, i32
  }
  func.func @transform_2(%arg0: i32) -> (i32, i32) {
    %c0_i32 = arith.constant 0 : i32
    %c0_i32_0 = arith.constant 0 : i32
    return %c0_i32, %arg0 : i32, i32
  }
  func.func @transform_3(%arg0: i32) -> (i32, i32) {
    %c0_i32 = arith.constant 0 : i32
    %c0_i32_0 = arith.constant 0 : i32
    return %c0_i32, %arg0 : i32, i32
  }
  func.func @transform_4(%arg0: i32) -> (i32, i32) {
    %c0_i32 = arith.constant 0 : i32
    %c0_i32_0 = arith.constant 0 : i32
    return %c0_i32, %arg0 : i32, i32
  }
  func.func @transform_5(%arg0: i32) -> (i32, i32) {
    %c0_i32 = arith.constant 0 : i32
    %c0_i32_0 = arith.constant 0 : i32
    return %c0_i32, %arg0 : i32, i32
  }
  func.func @transform_6(%arg0: i32) -> (i32, i32) {
    %c0_i32 = arith.constant 0 : i32
    %c0_i32_0 = arith.constant 0 : i32
    return %c0_i32, %arg0 : i32, i32
  }
}

module attributes {stable_mosaic.version = 11 : i64} {
  func.func @kernel(%arg0: i32, %arg1: memref<128x1xf32, #tpu.memory_space<vmem>>, %arg2: memref<128x64xbf16, #tpu.memory_space<vmem>>, %arg3: memref<64x128xbf16, #tpu.memory_space<vmem>>, %arg4: memref<1x128xf32, #tpu.memory_space<vmem>>, %arg5: memref<1x128xf32, #tpu.memory_space<vmem>>, %arg6: memref<1x128xf32, #tpu.memory_space<vmem>>, %arg7: memref<128x128xbf16, #tpu.memory_space<vmem>>) attributes {dimension_semantics = [#tpu.dimension_semantics<parallel>], iteration_bounds = array<i64: 2>, scalar_prefetch = 0 : i64, scratch_operands = 0 : i64, tpu.core_type = #tpu.core_type<tc>, window_params = [{pipeline_mode = #tpu.pipeline_mode<synchronous>, transform_indices = @transform_0, window_bounds = array<i64: 128, 1>}, {pipeline_mode = #tpu.pipeline_mode<synchronous>, transform_indices = @transform_1, window_bounds = array<i64: 128, 64>}, {transform_indices = @transform_2, window_bounds = array<i64: 64, 128>}, {transform_indices = @transform_3, window_bounds = array<i64: 1, 128>}, {transform_indices = @transform_4, window_bounds = array<i64: 1, 128>}, {transform_indices = @transform_5, window_bounds = array<i64: 1, 128>}, {transform_indices = @transform_6, window_bounds = array<i64: 128, 128>}]} {
    %c0 = arith.constant 0 : index
    %c0_0 = arith.constant 0 : index
    %0 = vector.load %arg1[%c0, %c0_0] : memref<128x1xf32, #tpu.memory_space<vmem>>, vector<128x1xf32>
    %c0_1 = arith.constant 0 : index
    %c0_2 = arith.constant 0 : index
    %1 = vector.load %arg2[%c0_1, %c0_2] : memref<128x64xbf16, #tpu.memory_space<vmem>>, vector<128x64xbf16>
    %c0_3 = arith.constant 0 : index
    %c0_4 = arith.constant 0 : index
    %2 = vector.load %arg3[%c0_3, %c0_4] : memref<64x128xbf16, #tpu.memory_space<vmem>>, vector<64x128xbf16>
    %cst = arith.constant dense<0.000000e+00> : vector<128x128xf32>
    %3 = tpu.matmul %1, %2, %cst {dimension_numbers = #tpu.dot_dimension_numbers<[1], [0], [0], [1], [0, 0, 1, 1], [], []>} : vector<128x64xbf16>, vector<64x128xbf16>, vector<128x128xf32> -> vector<128x128xf32>
    %c0_5 = arith.constant 0 : index
    %c0_6 = arith.constant 0 : index
    %4 = vector.load %arg4[%c0_5, %c0_6] : memref<1x128xf32, #tpu.memory_space<vmem>>, vector<1x128xf32>
    %5 = vector.broadcast %4 : vector<1x128xf32> to vector<128x128xf32>
    %6 = arith.addf %3, %5 : vector<128x128xf32>
    %7 = vector.broadcast %0 : vector<128x1xf32> to vector<128x128xf32>
    %8 = arith.mulf %6, %7 : vector<128x128xf32>
    %cst_7 = arith.constant dense<0.000000e+00> : vector<128xf32>
    %9 = vector.multi_reduction <add>, %8, %cst_7 [0] : vector<128x128xf32> to vector<128xf32>
    %10 = vector.shape_cast %9 : vector<128xf32> to vector<1x128xf32>
    %cst_8 = arith.constant 1.250000e-01 : f32
    %11 = vector.broadcast %cst_8 : f32 to vector<1x128xf32>
    %12 = arith.mulf %10, %11 : vector<1x128xf32>
    %13 = vector.broadcast %12 : vector<1x128xf32> to vector<128x128xf32>
    %14 = arith.subf %6, %13 : vector<128x128xf32>
    %15 = vector.broadcast %0 : vector<128x1xf32> to vector<128x128xf32>
    %16 = arith.mulf %14, %15 : vector<128x128xf32>
    %17 = arith.mulf %16, %16 : vector<128x128xf32>
    %cst_9 = arith.constant dense<0.000000e+00> : vector<128xf32>
    %18 = vector.multi_reduction <add>, %17, %cst_9 [0] : vector<128x128xf32> to vector<128xf32>
    %19 = vector.shape_cast %18 : vector<128xf32> to vector<1x128xf32>
    %cst_10 = arith.constant 1.250000e-01 : f32
    %20 = vector.broadcast %cst_10 : f32 to vector<1x128xf32>
    %21 = arith.mulf %19, %20 : vector<1x128xf32>
    %22 = vector.broadcast %12 : vector<1x128xf32> to vector<128x128xf32>
    %23 = arith.subf %6, %22 : vector<128x128xf32>
    %cst_11 = arith.constant 9.99999974E-6 : f32
    %24 = vector.broadcast %cst_11 : f32 to vector<1x128xf32>
    %25 = arith.addf %21, %24 : vector<1x128xf32>
    %26 = math.rsqrt %25 : vector<1x128xf32>
    %27 = vector.broadcast %26 : vector<1x128xf32> to vector<128x128xf32>
    %28 = arith.mulf %23, %27 : vector<128x128xf32>
    %c0_12 = arith.constant 0 : index
    %c0_13 = arith.constant 0 : index
    %29 = vector.load %arg5[%c0_12, %c0_13] : memref<1x128xf32, #tpu.memory_space<vmem>>, vector<1x128xf32>
    %30 = vector.broadcast %29 : vector<1x128xf32> to vector<128x128xf32>
    %31 = arith.mulf %28, %30 : vector<128x128xf32>
    %c0_14 = arith.constant 0 : index
    %c0_15 = arith.constant 0 : index
    %32 = vector.load %arg6[%c0_14, %c0_15] : memref<1x128xf32, #tpu.memory_space<vmem>>, vector<1x128xf32>
    %33 = vector.broadcast %32 : vector<1x128xf32> to vector<128x128xf32>
    %34 = arith.addf %31, %33 : vector<128x128xf32>
    %cst_16 = arith.constant 0.000000e+00 : f32
    %35 = vector.broadcast %cst_16 : f32 to vector<128x128xf32>
    %36 = arith.maximumf %34, %35 : vector<128x128xf32>
    %37 = vector.broadcast %0 : vector<128x1xf32> to vector<128x128xf32>
    %38 = arith.mulf %36, %37 : vector<128x128xf32>
    %39 = arith.truncf %38 : vector<128x128xf32> to vector<128x128xbf16>
    %c0_17 = arith.constant 0 : index
    %c0_18 = arith.constant 0 : index
    %40 = vector.load %arg7[%c0_17, %c0_18] : memref<128x128xbf16, #tpu.memory_space<vmem>>, vector<128x128xbf16>
    tpu.vector_store %arg7[%c0_17, %c0_18], %39 {strides = array<i32>} : memref<128x128xbf16, #tpu.memory_space<vmem>>, vector<128x128xbf16>,
    return
  }
  func.func @transform_0(%arg0: i32) -> (i32, i32) {
    %c0_i32 = arith.constant 0 : i32
    %c0_i32_0 = arith.constant 0 : i32
    %c0_i32_1 = arith.constant 0 : i32
    return %c0_i32, %c0_i32_0 : i32, i32
  }
  func.func @transform_1(%arg0: i32) -> (i32, i32) {
    %c0_i32 = arith.constant 0 : i32
    %c0_i32_0 = arith.constant 0 : i32
    %c0_i32_1 = arith.constant 0 : i32
    return %c0_i32, %c0_i32_0 : i32, i32
  }
  func.func @transform_2(%arg0: i32) -> (i32, i32) {
    %c0_i32 = arith.constant 0 : i32
    %c0_i32_0 = arith.constant 0 : i32
    return %c0_i32, %arg0 : i32, i32
  }
  func.func @transform_3(%arg0: i32) -> (i32, i32) {
    %c0_i32 = arith.constant 0 : i32
    %c0_i32_0 = arith.constant 0 : i32
    return %c0_i32, %arg0 : i32, i32
  }
  func.func @transform_4(%arg0: i32) -> (i32, i32) {
    %c0_i32 = arith.constant 0 : i32
    %c0_i32_0 = arith.constant 0 : i32
    return %c0_i32, %arg0 : i32, i32
  }
  func.func @transform_5(%arg0: i32) -> (i32, i32) {
    %c0_i32 = arith.constant 0 : i32
    %c0_i32_0 = arith.constant 0 : i32
    return %c0_i32, %arg0 : i32, i32
  }
  func.func @transform_6(%arg0: i32) -> (i32, i32) {
    %c0_i32 = arith.constant 0 : i32
    %c0_i32_0 = arith.constant 0 : i32
    return %c0_i32, %arg0 : i32, i32
  }
}

</mosaic_0001>

<bundles_post_ra>
// kernel: tpu_custom_call.1
= control target key start
LH: loop header
LB: loop body
LE: loop exit
PB: predicated region body
PF: predicated region fallthrough
CT: control target
= control target key end

     0   :  { %11 = vsyncpa [#allocation4], 0  ;;  %s1654_s0 = inlined_call_operand.vmem [shape: f32[128,1], index: 0, kind: input, shape index: {}]   ;;  %s1655_s1 = inlined_call_operand.vmem [shape: bf16[128,64], index: 1, kind: input, shape index: {}]   ;;  %s1656_s2 = inlined_call_operand.vmem [shape: bf16[64,256], index: 2, kind: input, shape index: {}]   ;;  %s1657_s3 = inlined_call_operand.vmem [shape: f32[1,256], index: 3, kind: input, shape index: {}]   ;;  %s1658_s4 = inlined_call_operand.vmem [shape: f32[1,256], index: 4, kind: input, shape index: {}]   ;;  %s1659_s5 = inlined_call_operand.vmem [shape: f32[1,256], index: 5, kind: input, shape index: {}]   ;;  %s1660_s6 = inlined_call_operand.hbm [shape: bf16[128,256], index: 6, kind: output, shape index: {}]  }
   0x1   :  { %13 = vsyncpa [#allocation4 + $0x1], 0  ;;  %s1268_s21 = smov 0   ;;  %s1270_s22 = smov 0  }
   0x2   :  { %s1272_s23 = smov 0   ;;  %s1274_s24 = smov 0  }
   0x3 LB: > { %s1289_s25 = sadd.s32 4294967295, %s1227_s24   ;;  %s975_s26 = sadd.s32 4294967294, %s1227_s24   ;;  %s1227_s24 = sphi %s1274_s24, %s1666_s24   ;;  %s1223_s23 = sphi %s1272_s23, %s1665_s23   ;;  %s1219_s22 = sphi %s1270_s22, %s1664_s22   ;;  %s1215_s21 = sphi %s1268_s21, %s1663_s21  }
   0x4   : > { %s1293_s27 = sadd.s32 1, %s1227_s24   ;;  %s68_s28 = sadd.s32 1, %s1223_s23 }
   0x5   : > { %s65_s29 = ssub.s32 %s1227_s24, %s1293_s27  ;;  %p75_p0 = scmp.ne.s32.totalorder %s1223_s23, %s1219_s22 }
   0x6   : > { %p66_p1 = scmp.eq.s32.totalorder %s65_s29, 0  ;;  %p76_p2 = scmp.eq.s32.totalorder %s1227_s24, 0 }
   0x7   : > { %p183_p3 = scmp.eq.s32.totalorder %s1289_s25, 1  ;;  %p188_p4 = scmp.ne.s32.totalorder %s1219_s22, %s1215_s21 }
   0x8   : > { %s1305_s30 = scalar_select %p66_p1, %s1223_s23, %s68_s28  }
   0x9   : > { %p77_p5 = por %p76_p2, %p75_p0  ;;  %p1307_p6 = por %p183_p3, %p75_p0 }
   0xa   : > { %p189_p7 = scmp.eq.s32.totalorder %s975_s26, 1  ;;  %p977_p9 = scmp.ge.s32.totalorder %s1227_s24, 2 }
   0xc   : > { %p1311_p8 = por %p189_p7, %p188_p4  ;;  %211 = sbr.rel (%p977_p9) target bundleno = 29 (0x1d), region = 24 }
  0x11   : > { %214 = sbr.rel (!%p77_p5) target bundleno = 29 (0x1d), region = 28  ;;  %s216_s9 = sand.u32 (%p77_p5), 1, %s1223_s23  }
  0x12   : > { %s979_s10 = sshll.u32 (%p77_p5), %s1227_s24, 2  ;;  %s978_s11 = sshll.u32 (%p77_p5), %s216_s9, 5 }
  0x13   : > { %s220_s14 = scalar_lea.vmem (%p77_p5), %s1656_s2, %s979_s10  ;;  %s218_s15 = scalar_lea.vmem (%p77_p5), [#allocation2], %s978_s11 }
  0x14   : > { %v237_v0 = vld [vmem:[%s220_s14] sm:$0xf] (%p77_p5)  ;;  %v239_v1 = vld [vmem:[%s220_s14 + $0x8] sm:$0xf] (%p77_p5)  ;;  %v241_v2 = vld [vmem:[%s220_s14 + $0x10] sm:$0xf] (%p77_p5) }
  0x15   : > { %238 = vst [vmem:[%s218_s15] sm:$0xf] (%p77_p5), %v237_v0  ;;  %v243_v3 = vld [vmem:[%s220_s14 + $0x18] sm:$0xf] (%p77_p5)  ;;  %v245_v4 = vld [vmem:[%s220_s14 + $0x20] sm:$0xf] (%p77_p5) }
  0x16   : > { %240 = vst [vmem:[%s218_s15 + $0x4] sm:$0xf] %v239_v1  ;;  %v247_v5 = vld [vmem:[%s220_s14 + $0x28] sm:$0xf]  ;;  %v249_v6 = vld [vmem:[%s220_s14 + $0x30] sm:$0xf] }
  0x17   : > { %242 = vst [vmem:[%s218_s15 + $0x8] sm:$0xf] %v241_v2  ;;  %v251_v7 = vld [vmem:[%s220_s14 + $0x38] sm:$0xf] }
  0x18   : > { %244 = vst [vmem:[%s218_s15 + $0xc] sm:$0xf] %v243_v3 }
  0x19   : > { %246 = vst [vmem:[%s218_s15 + $0x10] sm:$0xf] %v245_v4 }
  0x1a   : > { %248 = vst [vmem:[%s218_s15 + $0x14] sm:$0xf] %v247_v5 }
  0x1b   : > { %250 = vst [vmem:[%s218_s15 + $0x18] sm:$0xf] %v249_v6 }
  0x1c   : > { %252 = vst [vmem:[%s218_s15 + $0x1c] sm:$0xf] %v251_v7 }
  0x1d PF: > { %p980_p10 = scmp.ge.s32.totalorder %s1227_s24, 1  ;;  %p309_p11 = scmp.lt.s32.totalorder %s1227_s24, 3 }
  0x1f   : > { %p310_p12 = pnand %p980_p10, %p309_p11 }
  0x20   : > { %s1329_s18 = sand.u32 (!%p310_p12), 1, %s1219_s22   ;;  %p354_p13 = scmp.lt.s32.totalorder (!%p310_p12), %s1289_s25, 1 }
  0x21   : > { %313 = sbr.rel (%p310_p12) target bundleno = 354 (0x162), region = 81  ;;  %s981_s26 = sshll.u32 (!%p310_p12), %s1329_s18, 5 }
  0x22   : > { %s318_s28 = scalar_lea.vmem (!%p310_p12), [#allocation2], %s981_s26  ;;  %s1040_s19 = sshll.u32 (!%p310_p12), %s1289_s25, 2 }
  0x23   : > { %s876_s26 = scalar_lea.hbm (!%p310_p12), %s1660_s6, %s1040_s19  ;;  %s1185_s15 = scalar_lea.hbm (!%p310_p12), %s1660_s6, 128 }
  0x26   : > { %v364_v8 = vld [vmem:[%s1654_s0] sm:$0xff]  ;;  %v366_v9 = vld [vmem:[%s1654_s0 + $0x10] sm:$0xff]  ;;  %v1229_v10 = vmov 0   ;;  %v1054_v11 = vld [vmem:[%s318_s28 + $0x18] sm:$0xff]  ;;  %s1349_s16 = scalar_select %p354_p13, %s1289_s25, 1  ;;  %vm472_vm0 = vcmask 523264  }
  0x27   : > { %1157 = vset.pattern.permute.xlu0 %v1229_v10  ;;  %1158 = vset.pattern.permute.xlu1 %v1229_v10  ;;  %v1053_v12 = vld [vmem:[%s318_s28 + $0x10] sm:$0xff]  ;;  %v365_v13 = vld [vmem:[%s1654_s0 + $0x8] sm:$0xff]  ;;  %v368_v14 = vld [vmem:[%s1654_s0 + $0x20] sm:$0xff] }
  0x28   : > { %548 = vperm.xlu0 %1157, %v364_v8   ;;  %558 = vperm.xlu1 %1158, %v366_v9   ;;  %v367_v15 = vld [vmem:[%s1654_s0 + $0x18] sm:$0xff]  ;;  %v1052_v16 = vld [vmem:[%s318_s28 + $0x8] sm:$0xff]  ;;  %v1051_v17 = vld [vmem:[%s318_s28] sm:$0xff]  ;;  %s356_s13 = scalar_lea.vmem %s1657_s3, %s1349_s16  ;;  %s359_s29 = scalar_lea.vmem %s1658_s4, %s1349_s16 }
  0x29   : > { %1159 = vset.pattern.permute.xlu2 %v1229_v10  ;;  %501 = vmatpush.bf16.msra.mxu0 %v1054_v11  ;;  %v369_v18 = vld [vmem:[%s1654_s0 + $0x28] sm:$0xff]  ;;  %v370_v19 = vld [vmem:[%s1654_s0 + $0x30] sm:$0xff]  ;;  %v1043_v20 = vld [vmem:[%s1655_s1] sm:$0xff]  ;;  %s362_s10 = scalar_lea.vmem %s1659_s5, %s1349_s16  ;;  %s982_s16 = sshll.u32 %s1329_s18, 6 }
  0x2a   : > { %1102 = vmatpush.bf16.msra.mxu1 %v1054_v11  ;;  %1103 = vmatpush.bf16.msra.mxu2 %v1054_v11  ;;  %v1045_v21 = vld [vmem:[%s1655_s1 + $0x10] sm:$0xff]  ;;  %v371_v22 = vld [vmem:[%s1654_s0 + $0x38] sm:$0xff]  ;;  %v1047_v23 = vld [vmem:[%s1655_s1 + $0x20] sm:$0xff]  ;;  %s879_s28 = sshll.u32 %s876_s26, 4  ;;  %s880_s28 = int_to_ptr.hbm [resolvable:$true] %s879_s28 }
  0x2b   : > { %1104 = vmatpush.bf16.msra.mxu3 %v1054_v11  ;;  %568 = vperm.xlu2 %1159, %v368_v14   ;;  %v1049_v24 = vld [vmem:[%s1655_s1 + $0x30] sm:$0xff]  ;;  %v372_v25 = vld [vmem:[%s1654_s0 + $0x40] sm:$0xff]  ;;  %v373_v26 = vld [vmem:[%s1654_s0 + $0x48] sm:$0xff]  ;;  %s1179_s11 = sshra.s32 %s880_s28, 4  ;;  %s1180_s11 = int_to_ptr.hbm [resolvable:$true] %s1179_s11 }
  0x2c   : > { %v374_v27 = vld [vmem:[%s1654_s0 + $0x50] sm:$0xff]  ;;  %v375_v28 = vld [vmem:[%s1654_s0 + $0x58] sm:$0xff]  ;;  %v376_v29 = vld [vmem:[%s1654_s0 + $0x60] sm:$0xff]  ;;  %s1181_s12 = scalar_lea.hbm %s1180_s11, 64  ;;  %p1186_p3 = scmp.lt.s32.totalorder %s1180_s11, %s1660_s6 }
  0x2d   : > { %502 = vmatpush.bf16.msra.mxu0 %v1053_v12  ;;  %v1044_v30 = vld [vmem:[%s1655_s1 + $0x8] sm:$0xff]  ;;  %v1046_v31 = vld [vmem:[%s1655_s1 + $0x18] sm:$0xff]  ;;  %v378_v35 = vld [vmem:[%s1654_s0 + $0x70] sm:$0xff]  ;;  %p1182_p0 = scmp.ne.s32.totalorder %s1180_s11, %s1181_s12  ;;  %p1187_p4 = scmp.lt.s32.totalorder %s1185_s15, %s1181_s12 }
  0x2e   : > { %1105 = vmatpush.bf16.msra.mxu1 %v1053_v12  ;;  %1106 = vmatpush.bf16.msra.mxu2 %v1053_v12  ;;  %v377_v32 = vld [vmem:[%s1654_s0 + $0x68] sm:$0xff]  ;;  %v1050_v34 = vld [vmem:[%s1655_s1 + $0x38] sm:$0xff]  ;;  %v1160_v48 = vld [vmem:[%s356_s13] ss:$0 sm:$0xff] }
  0x2f   : > { %1107 = vmatpush.bf16.msra.mxu3 %v1053_v12  ;;  %v1048_v33 = vld [vmem:[%s1655_s1 + $0x28] sm:$0xff]  ;;  %v379_v36 = vld [vmem:[%s1654_s0 + $0x78] sm:$0xff]  ;;  %p1183_p1 = pnand %p1182_p0, %p1307_p6  ;;  %p1188_p5 = por %p1187_p4, %p1186_p3 }
  0x30   : > { %553 = vperm.xlu0 %1157, %v365_v13   ;;  %563 = vperm.xlu1 %1158, %v367_v15  }
  0x31   : > { %503 = vmatpush.bf16.msra.mxu0 %v1052_v16  ;;  %p1184_p2 = pneg %p1183_p1 }
  0x32   : > { %1108 = vmatpush.bf16.msra.mxu1 %v1052_v16  ;;  %1109 = vmatpush.bf16.msra.mxu2 %v1052_v16 }
  0x33   : > { %1110 = vmatpush.bf16.msra.mxu3 %v1052_v16  ;;  %573 = vperm.xlu2 %1159, %v369_v18   ;;  %p1189_p7 = pnand %p1188_p5, %p1184_p2 }
  0x35   : > { %504 = vmatpush.bf16.msra.mxu0 %v1051_v17 }
  0x36   : > { %1111 = vmatpush.bf16.msra.mxu1 %v1051_v17  ;;  %1112 = vmatpush.bf16.msra.mxu2 %v1051_v17 }
  0x37   : > { %1113 = vmatpush.bf16.msra.mxu3 %v1051_v17 }
  0x38   : > { %578 = vperm.xlu0 %1157, %v370_v19   ;;  %583 = vperm.xlu1 %1158, %v371_v22  }
  0x39   : > { %1031 = vmatmul.msk.bf16.vlgmr.msra.gmra.mxu0 %vm472_vm0, %v1043_v20  ;;  %1033 = vmatmul.msk.bf16.vlgmr.msra.gmra.mxu1 %vm472_vm0, %v1045_v21 }
  0x3a   : > { %1035 = vmatmul.msk.bf16.vlgmr.msra.gmra.mxu2 %vm472_vm0, %v1047_v23  ;;  %1037 = vmatmul.msk.bf16.vlgmr.msra.gmra.mxu3 %vm472_vm0, %v1049_v24 }
  0x3b   : > { %588 = vperm.xlu2 %1159, %v372_v25  }
  0x40   : > { %593 = vperm.xlu0 %1157, %v373_v26   ;;  %598 = vperm.xlu1 %1158, %v374_v27  }
  0x43   : > { %603 = vperm.xlu2 %1159, %v375_v28  }
  0x48   : > { %608 = vperm.xlu0 %1157, %v376_v29   ;;  %613 = vperm.xlu1 %1158, %v377_v32  }
  0x49   : > { %1032 = vmatmul.msk.bf16.gmra.mxu0 %vm472_vm0, %v1044_v30  ;;  %1034 = vmatmul.msk.bf16.gmra.mxu1 %vm472_vm0, %v1046_v31 }
  0x4a   : > { %1036 = vmatmul.msk.bf16.gmra.mxu2 %vm472_vm0, %v1048_v33  ;;  %1038 = vmatmul.msk.bf16.gmra.mxu3 %vm472_vm0, %v1050_v34 }
  0x4b   : > { %618 = vperm.xlu2 %1159, %v378_v35  }
  0x50   : > { %623 = vperm.xlu0 %1157, %v379_v36  }
  0x85   : > { %v1429_v42 = vpop.permute.xlu2 %568 }
  0x8d   : > { %v1442_v52 = vpop.permute.xlu2 %573 }
  0x95   : > { %v1466_v6 = vpop.permute.xlu2 %588 }
  0x9a   : > { %v1425_v37 = vpop.permute.xlu0 %548  ;;  %v1427_v40 = vpop.permute.xlu1 %558 }
  0x9d   : > { %v1489_v27 = vpop.permute.xlu2 %603 }
  0xa2   : > { %v1431_v45 = vpop.permute.xlu0 %553  ;;  %v1433_v47 = vpop.permute.xlu1 %563 }
  0xaa   : > { %v1448_v56 = vpop.permute.xlu0 %578  ;;  %v1460_v1 = vpop.permute.xlu1 %583 }
  0xb2   : > { %v1472_v11 = vpop.permute.xlu0 %593  ;;  %v1483_v22 = vpop.permute.xlu1 %598 }
  0xb6   : > { %v506_v38 = vpop.f32.mrf.mxu0  ;;  %v516_v39 = vpop.f32.mrf.mxu1 }
  0xb7   : > { %v1444_v54 = vadd.f32 %v1160_v48, %v506_v38  ;;  %v1456_v62 = vadd.f32 %v1160_v48, %v516_v39 }
  0xb9   : > { %v626_v58 = vmul.f32 %v1425_v37, %v1444_v54  ;;  %v630_v8 = vmul.f32 %v1429_v42, %v1456_v62 }
  0xba   : > { %v1493_v31 = vpop.permute.xlu0 %608 }
  0xbd   : > { %v526_v41 = vpop.f32.mrf.mxu2  ;;  %v536_v46 = vpop.f32.mrf.mxu3 }
  0xbe   : > { %v508_v43 = vpop.f32.mrf.mxu0  ;;  %v518_v44 = vpop.f32.mrf.mxu1  ;;  %v1476_v15 = vadd.f32 %v1160_v48, %v526_v41  ;;  %v1495_v32 = vadd.f32 %v1160_v48, %v536_v46 }
  0xbf   : > { %v1440_v51 = vadd.f32 %v1160_v48, %v508_v43  ;;  %v1462_v3 = vadd.f32 %v1160_v48, %v518_v44 }
  0xc0   : > { %v634_v24 = vmul.f32 %v1466_v6, %v1476_v15  ;;  %v638_v41 = vmul.f32 %v1493_v31, %v1495_v32 }
  0xc1   : > { %v627_v57 = vmul.f32 %v1431_v45, %v1440_v51  ;;  %v631_v12 = vmul.f32 %v1442_v52, %v1462_v3 }
  0xc3   : > { %v642_v63 = vadd.f32 %v627_v57, %v626_v58  ;;  %v1512_v57 = vpop.permute.xlu2 %618 }
  0xc5   : > { %v528_v49 = vpop.f32.mrf.mxu2  ;;  %v538_v60 = vpop.f32.mrf.mxu3 }
  0xc6   : > { %v511_v50 = vpop.f32.mrf.mxu0  ;;  %v521_v53 = vpop.f32.mrf.mxu1  ;;  %v1480_v19 = vadd.f32 %v1160_v48, %v528_v49  ;;  %v1499_v35 = vadd.f32 %v1160_v48, %v538_v60 }
  0xc7   : > { %v1446_v55 = vadd.f32 %v1160_v48, %v511_v50  ;;  %v1470_v9 = vadd.f32 %v1160_v48, %v521_v53  ;;  %v1506_v49 = vpop.permute.xlu1 %613  ;;  %v1516_v60 = vpop.permute.xlu0 %623 }
  0xc8   : > { %v635_v28 = vmul.f32 %v1472_v11, %v1480_v19  ;;  %v639_v46 = vmul.f32 %v1506_v49, %v1499_v35 }
  0xc9   : > { %v628_v59 = vmul.f32 %v1427_v40, %v1446_v55  ;;  %v632_v16 = vmul.f32 %v1448_v56, %v1470_v9 }
  0xcb   : > { %v643_v4 = vadd.f32 %v642_v63, %v628_v59 }
  0xcd   : > { %v531_v2 = vpop.f32.mrf.mxu2  ;;  %v541_v18 = vpop.f32.mrf.mxu3 }
  0xce   : > { %v513_v61 = vpop.f32.mrf.mxu0  ;;  %v523_v7 = vpop.f32.mrf.mxu1  ;;  %v1487_v25 = vadd.f32 %v1160_v48, %v531_v2  ;;  %v1504_v43 = vadd.f32 %v1160_v48, %v541_v18 }
  0xcf   : > { %v1458_v0 = vadd.f32 %v1160_v48, %v513_v61  ;;  %v524_v14 = vadd.f32 %v1160_v48, %v523_v7 }
  0xd0   : > { %v636_v33 = vmul.f32 %v1483_v22, %v1487_v25  ;;  %v640_v58 = vmul.f32 %v1512_v57, %v1504_v43 }
  0xd1   : > { %v629_v5 = vmul.f32 %v1433_v47, %v1458_v0  ;;  %v633_v20 = vmul.f32 %v1460_v1, %v524_v14 }
  0xd3   : > { %v644_v10 = vadd.f32 %v643_v4, %v629_v5 }
  0xd5   : > { %v645_v13 = vadd.f32 %v644_v10, %v630_v8  ;;  %v533_v23 = vpop.f32.mrf.mxu2  ;;  %v543_v39 = vpop.f32.mrf.mxu3 }
  0xd6   : > { %v534_v30 = vadd.f32 %v1160_v48, %v533_v23  ;;  %v1510_v53 = vadd.f32 %v1160_v48, %v543_v39 }
  0xd7   : > { %v646_v17 = vadd.f32 %v645_v13, %v631_v12 }
  0xd8   : > { %v637_v36 = vmul.f32 %v1489_v27, %v534_v30  ;;  %v641_v61 = vmul.f32 %v1516_v60, %v1510_v53 }
  0xd9   : > { %v647_v21 = vadd.f32 %v646_v17, %v632_v16 }
  0xdb   : > { %v648_v26 = vadd.f32 %v647_v21, %v633_v20 }
  0xdd   : > { %v649_v29 = vadd.f32 %v648_v26, %v634_v24 }
  0xdf   : > { %v650_v34 = vadd.f32 %v649_v29, %v635_v28 }
  0xe1   : > { %v651_v38 = vadd.f32 %v650_v34, %v636_v33 }
  0xe3   : > { %v652_v44 = vadd.f32 %v651_v38, %v637_v36 }
  0xe5   : > { %v653_v50 = vadd.f32 %v652_v44, %v638_v41 }
  0xe7   : > { %v654_v59 = vadd.f32 %v653_v50, %v639_v46 }
  0xe9   : > { %v655_v63 = vadd.f32 %v654_v59, %v640_v58 }
  0xeb   : > { %v656_v2 = vadd.f32 %v655_v63, %v641_v61 }
  0xed   : > { %v657_v4 = vrot.slane %v656_v2, 4 }
  0xef   : > { %v658_v5 = vadd.f32 %v657_v4, %v656_v2 }
  0xf1   : > { %v659_v7 = vrot.slane %v658_v5, 2 }
  0xf3   : > { %v660_v8 = vadd.f32 %v659_v7, %v658_v5 }
  0xf5   : > { %v661_v10 = vrot.slane %v660_v8, 1 }
  0xf7   : > { %v662_v48 = vadd.f32 %v661_v10, %v660_v8 }
  0xf9   : > { %v663_v12 = vmul.f32 0.125, %v662_v48 }
  0xfb   : > { %v1521_v13 = vsub.f32 %v1444_v54, %v663_v12  ;;  %v1524_v16 = vsub.f32 %v1440_v51, %v663_v12  ;;  %v1527_v17 = vsub.f32 %v1446_v55, %v663_v12  ;;  %v1534_v21 = vsub.f32 %v1458_v0, %v663_v12 }
  0xfc   : > { %v1537_v23 = vsub.f32 %v1456_v62, %v663_v12  ;;  %v1542_v55 = vsub.f32 %v1462_v3, %v663_v12  ;;  %v1547_v28 = vsub.f32 %v1470_v9, %v663_v12  ;;  %v1551_v33 = vsub.f32 %v524_v14, %v663_v12 }
  0xfd   : > { %v680_v18 = vmul.f32 %v1521_v13, %v1425_v37  ;;  %v681_v20 = vmul.f32 %v1524_v16, %v1431_v45  ;;  %v682_v54 = vmul.f32 %v1527_v17, %v1427_v40  ;;  %v683_v26 = vmul.f32 %v1534_v21, %v1433_v47 }
  0xfe   : > { %v684_v0 = vmul.f32 %v1537_v23, %v1429_v42  ;;  %v685_v34 = vmul.f32 %v1542_v55, %v1442_v52  ;;  %v1556_v3 = vsub.f32 %v1476_v15, %v663_v12  ;;  %v686_v39 = vmul.f32 %v1547_v28, %v1448_v56 }
  0xff   : > { %v696_v51 = vmul.f32 %v680_v18, %v680_v18  ;;  %v697_v24 = vmul.f32 %v681_v20, %v681_v20  ;;  %v698_v29 = vmul.f32 %v682_v54, %v682_v54  ;;  %v699_v36 = vmul.f32 %v683_v26, %v683_v26 }
 0x100   : > { %v700_v9 = vmul.f32 %v684_v0, %v684_v0  ;;  %v1561_v44 = vsub.f32 %v1480_v19, %v663_v12  ;;  %v687_v14 = vmul.f32 %v1551_v33, %v1460_v1  ;;  %v701_v46 = vmul.f32 %v685_v34, %v685_v34 }
 0x101   : > { %v712_v62 = vadd.f32 %v697_v24, %v696_v51  ;;  %v1566_v58 = vsub.f32 %v1487_v25, %v663_v12  ;;  %v688_v15 = vmul.f32 %v1556_v3, %v1466_v6  ;;  %v702_v59 = vmul.f32 %v686_v39, %v686_v39 }
 0x102   : > { %v675_v63 = vsub.f32 %v534_v30, %v663_v12  ;;  %v689_v2 = vmul.f32 %v1561_v44, %v1472_v11  ;;  %v703_v4 = vmul.f32 %v687_v14, %v687_v14  ;;  %v676_v5 = vsub.f32 %v1495_v32, %v663_v12 }
 0x103   : > { %v713_v38 = vadd.f32 %v712_v62, %v698_v29  ;;  %v690_v7 = vmul.f32 %v1566_v58, %v1483_v22  ;;  %v704_v8 = vmul.f32 %v688_v15, %v688_v15  ;;  %v677_v25 = vsub.f32 %v1499_v35, %v663_v12 }
 0x104   : > { %v691_v48 = vmul.f32 %v675_v63, %v1489_v27  ;;  %v705_v18 = vmul.f32 %v689_v2, %v689_v2  ;;  %v678_v30 = vsub.f32 %v1504_v43, %v663_v12  ;;  %v692_v54 = vmul.f32 %v676_v5, %v1493_v31 }
 0x105   : > { %v714_v41 = vadd.f32 %v713_v38, %v699_v36  ;;  %v706_v51 = vmul.f32 %v690_v7, %v690_v7  ;;  %v679_v26 = vsub.f32 %v1510_v53, %v663_v12  ;;  %v693_v32 = vmul.f32 %v677_v25, %v1506_v49 }
 0x106   : > { %v707_v0 = vmul.f32 %v691_v48, %v691_v48  ;;  %v694_v62 = vmul.f32 %v678_v30, %v1512_v57  ;;  %v708_v34 = vmul.f32 %v692_v54, %v692_v54 }
 0x107   : > { %v715_v50 = vadd.f32 %v714_v41, %v700_v9  ;;  %v695_v36 = vmul.f32 %v679_v26, %v1516_v60  ;;  %v709_v38 = vmul.f32 %v693_v32, %v693_v32 }
 0x108   : > { %v710_v9 = vmul.f32 %v694_v62, %v694_v62 }
 0x109   : > { %v716_v61 = vadd.f32 %v715_v50, %v701_v46  ;;  %v711_v41 = vmul.f32 %v695_v36, %v695_v36 }
 0x10b   : > { %v717_v19 = vadd.f32 %v716_v61, %v702_v59 }
 0x10d   : > { %v718_v10 = vadd.f32 %v717_v19, %v703_v4 }
 0x10f   : > { %v719_v20 = vadd.f32 %v718_v10, %v704_v8 }
 0x111   : > { %v720_v24 = vadd.f32 %v719_v20, %v705_v18 }
 0x113   : > { %v721_v29 = vadd.f32 %v720_v24, %v706_v51  ;;  %v1161_v24 = vld [vmem:[%s359_s29] ss:$0 sm:$0xff]  ;;  %s353_s29 = scalar_lea.vmem [#allocation3], %s982_s16 }
 0x114   : > { %s877_s9 = sshll.u32 %s353_s29, 4  ;;  %s878_s9 = int_to_ptr.vmem [resolvable:$true] %s877_s9 }
 0x115   : > { %v722_v35 = vadd.f32 %v721_v29, %v707_v0 }
 0x117   : > { %v723_v39 = vadd.f32 %v722_v35, %v708_v34 }
 0x119   : > { %v724_v43 = vadd.f32 %v723_v39, %v709_v38 }
 0x11b   : > { %v725_v14 = vadd.f32 %v724_v43, %v710_v9 }
 0x11d   : > { %v726_v46 = vadd.f32 %v725_v14, %v711_v41 }
 0x11f   : > { %v727_v50 = vrot.slane %v726_v46, 4 }
 0x121   : > { %v728_v15 = vadd.f32 %v727_v50, %v726_v46 }
 0x123   : > { %v729_v53 = vrot.slane %v728_v15, 2 }
 0x125   : > { %v730_v12 = vadd.f32 %v729_v53, %v728_v15 }
 0x127   : > { %v731_v59 = vrot.slane %v730_v12, 1 }
 0x129   : > { %v732_v61 = vadd.f32 %v731_v59, %v730_v12 }
 0x12b   : > { %v733_v2 = vmul.f32 0.125, %v732_v61 }
 0x12d   : > { %v734_v4 = vadd.f32 1e-05, %v733_v2 }
 0x12f   : > { %1163 = vrsqrt.f32 %v734_v4  ;;  %vm741_vm2 = vweird.f32 %v734_v4 }
 0x135   : > { %v1164_v19 = vpop.eup %1163 }
 0x136   : > { %v736_v7 = vmul.f32 %v1164_v19, %v734_v4  ;;  %vm742_vm1 = vweird.f32 %v1164_v19 }
 0x137   : > { %vm743_vm3 = vmor %vm741_vm2, %vm742_vm1 }
 0x138   : > { %v737_v8 = vmul.f32 %v1164_v19, %v736_v7 }
 0x13a   : > { %v738_v10 = vmul.f32 0.5, %v737_v8 }
 0x13c   : > { %v739_v48 = vsub.f32 1.5, %v738_v10 }
 0x13e   : > { %v740_v18 = vmul.f32 %v1164_v19, %v739_v48 }
 0x140   : > { %v744_v20 = vsel %vm743_vm3, %v1164_v19, %v740_v18 }
 0x141   : > { %v747_v54 = vmul.f32 %v744_v20, %v1527_v17  ;;  %v748_v51 = vmul.f32 %v744_v20, %v1534_v21  ;;  %v749_v32 = vmul.f32 %v744_v20, %v1537_v23  ;;  %v750_v0 = vmul.f32 %v744_v20, %v1542_v55 }
 0x142   : > { %v751_v29 = vmul.f32 %v744_v20, %v1547_v28  ;;  %v752_v62 = vmul.f32 %v744_v20, %v1551_v33  ;;  %v753_v34 = vmul.f32 %v744_v20, %v1556_v3  ;;  %v754_v17 = vmul.f32 %v744_v20, %v1561_v44  ;;  %v1162_v28 = vld [vmem:[%s362_s10] ss:$0 sm:$0xff]  ;;  %s866_s10 = scalar_lea.sflag [#allocation4], %s1329_s18 }
 0x143   : > { %v755_v21 = vmul.f32 %v744_v20, %v1566_v58  ;;  %v756_v35 = vmul.f32 %v744_v20, %v675_v63  ;;  %v745_v36 = vmul.f32 %v744_v20, %v1521_v13  ;;  %v757_v38 = vmul.f32 %v744_v20, %v676_v5 }
 0x144   : > { %v758_v39 = vmul.f32 %v744_v20, %v677_v25  ;;  %v759_v9 = vmul.f32 %v744_v20, %v678_v30  ;;  %v746_v23 = vmul.f32 %v744_v20, %v1524_v16  ;;  %v760_v43 = vmul.f32 %v744_v20, %v679_v26 }
 0x145   : > { %v767_v55 = vmul.f32 %v1161_v24, %v747_v54  ;;  %v768_v41 = vmul.f32 %v1161_v24, %v748_v51  ;;  %v769_v33 = vmul.f32 %v1161_v24, %v749_v32  ;;  %v770_v3 = vmul.f32 %v1161_v24, %v750_v0 }
 0x146   : > { %v771_v44 = vmul.f32 %v1161_v24, %v751_v29  ;;  %v772_v58 = vmul.f32 %v1161_v24, %v752_v62  ;;  %v773_v63 = vmul.f32 %v1161_v24, %v753_v34  ;;  %v774_v14 = vmul.f32 %v1161_v24, %v754_v17 }
 0x147   : > { %v775_v13 = vmul.f32 %v1161_v24, %v755_v21  ;;  %v776_v5 = vmul.f32 %v1161_v24, %v756_v35  ;;  %v765_v25 = vmul.f32 %v1161_v24, %v745_v36  ;;  %v777_v30 = vmul.f32 %v1161_v24, %v757_v38 }
 0x148   : > { %v778_v46 = vmul.f32 %v1161_v24, %v758_v39  ;;  %v779_v16 = vmul.f32 %v1161_v24, %v759_v9  ;;  %v766_v26 = vmul.f32 %v1161_v24, %v746_v23  ;;  %v780_v50 = vmul.f32 %v1161_v24, %v760_v43 }
 0x149   : > { %v787_v15 = vadd.f32 %v1162_v28, %v767_v55  ;;  %v788_v53 = vadd.f32 %v1162_v28, %v768_v41  ;;  %v789_v12 = vadd.f32 %v1162_v28, %v769_v33  ;;  %v790_v59 = vadd.f32 %v1162_v28, %v770_v3 }
 0x14a   : > { %v791_v61 = vadd.f32 %v1162_v28, %v771_v44  ;;  %v792_v2 = vadd.f32 %v1162_v28, %v772_v58  ;;  %v793_v4 = vadd.f32 %v1162_v28, %v773_v63  ;;  %v794_v19 = vadd.f32 %v1162_v28, %v774_v14 }
 0x14b   : > { %v795_v7 = vadd.f32 %v1162_v28, %v775_v13  ;;  %v796_v8 = vadd.f32 %v1162_v28, %v776_v5  ;;  %v785_v10 = vadd.f32 %v1162_v28, %v765_v25  ;;  %v797_v48 = vadd.f32 %v1162_v28, %v777_v30 }
 0x14c   : > { %v798_v18 = vadd.f32 %v1162_v28, %v778_v46  ;;  %v799_v20 = vadd.f32 %v1162_v28, %v779_v16  ;;  %v786_v54 = vadd.f32 %v1162_v28, %v766_v26  ;;  %v800_v51 = vadd.f32 %v1162_v28, %v780_v50 }
 0x14d   : > { %v803_v32 = vmax.f32 %v787_v15, 0.0  ;;  %v804_v0 = vmax.f32 %v788_v53, 0.0  ;;  %v805_v24 = vmax.f32 %v789_v12, 0.0  ;;  %v806_v29 = vmax.f32 %v790_v59, 0.0 }
 0x14e   : > { %v807_v62 = vmax.f32 %v791_v61, 0.0  ;;  %v808_v34 = vmax.f32 %v792_v2, 0.0  ;;  %v809_v17 = vmax.f32 %v793_v4, 0.0  ;;  %v810_v21 = vmax.f32 %v794_v19, 0.0 }
 0x14f   : > { %v811_v35 = vmax.f32 %v795_v7, 0.0  ;;  %v812_v36 = vmax.f32 %v796_v8, 0.0  ;;  %v801_v38 = vmax.f32 %v785_v10, 0.0  ;;  %v813_v39 = vmax.f32 %v797_v48, 0.0 }
 0x150   : > { %v814_v9 = vmax.f32 %v798_v18, 0.0  ;;  %v815_v23 = vmax.f32 %v799_v20, 0.0  ;;  %v802_v43 = vmax.f32 %v786_v54, 0.0  ;;  %v816_v55 = vmax.f32 %v800_v51, 0.0 }
 0x151   : > { %v819_v41 = vmul.f32 %v803_v32, %v1427_v40  ;;  %v820_v28 = vmul.f32 %v804_v0, %v1433_v47  ;;  %v821_v33 = vmul.f32 %v805_v24, %v1429_v42  ;;  %v822_v3 = vmul.f32 %v806_v29, %v1442_v52 }
 0x152   : > { %v823_v44 = vmul.f32 %v807_v62, %v1448_v56  ;;  %v824_v58 = vmul.f32 %v808_v34, %v1460_v1  ;;  %v825_v63 = vmul.f32 %v809_v17, %v1466_v6  ;;  %v826_v14 = vmul.f32 %v810_v21, %v1472_v11 }
 0x153   : > { %v827_v13 = vmul.f32 %v811_v35, %v1483_v22  ;;  %v828_v5 = vmul.f32 %v812_v36, %v1489_v27  ;;  %v829_v40 = vmul.f32 %v813_v39, %v1493_v31  ;;  %v830_v47 = vmul.f32 %v814_v9, %v1506_v49 }
 0x154   : > { %v831_v42 = vmul.f32 %v815_v23, %v1512_v57  ;;  %v832_v52 = vmul.f32 %v816_v55, %v1516_v60  ;;  %v1063_v56 = vpack.c.bf16 %v820_v28, %v819_v41  ;;  %v1068_v25 = vpack.c.bf16 %v822_v3, %v821_v33 }
 0x155   : > { %v1073_v1 = vpack.c.bf16 %v824_v58, %v823_v44  ;;  %v817_v6 = vmul.f32 %v801_v38, %v1425_v37  ;;  %v818_v11 = vmul.f32 %v802_v43, %v1431_v45  ;;  %v1078_v22 = vpack.c.bf16 %v826_v14, %v825_v63 }
 0x156   : > { %1095 = vst [vmem:[%s353_s29 + $0x8] sm:$0xff] %v1063_v56   ;;  %v1083_v27 = vpack.c.bf16 %v828_v5, %v827_v13  ;;  %v1088_v31 = vpack.c.bf16 %v830_v47, %v829_v40  ;;  %v1093_v49 = vpack.c.bf16 %v832_v52, %v831_v42 }
 0x157   : > { %1096 = vst [vmem:[%s353_s29 + $0x10] sm:$0xff] %v1068_v25   ;;  %v1058_v57 = vpack.c.bf16 %v818_v11, %v817_v6 }
 0x158   : > { %1097 = vst [vmem:[%s353_s29 + $0x18] sm:$0xff] %v1073_v1  }
 0x159   : > { %1098 = vst [vmem:[%s353_s29 + $0x20] sm:$0xff] %v1078_v22  }
 0x15a   : > { %1099 = vst [vmem:[%s353_s29 + $0x28] sm:$0xff] %v1083_v27  }
 0x15b   : > { %1100 = vst [vmem:[%s353_s29 + $0x30] sm:$0xff] %v1088_v31  }
 0x15c   : > { %1101 = vst [vmem:[%s353_s29 + $0x38] sm:$0xff] %v1093_v49  }
 0x15d   : > { %1059 = vst [vmem:[%s353_s29] sm:$0xff] %v1058_v57  }
 0x15e   : > { %1192 = shalt.err (!%p1189_p7)
}
 0x15f   : > { %s1230_s18 = smov 64   ;;  %s1231_s19 = smov 128  }
 0x160   : > { %s1232_s25 = smov 4  }
 0x161   : > { %1114 = dma.vmem_to_hbm [thread:$0]  (%p1307_p6), %s878_s9, 1024, %s880_s28, %s866_s10, %s1230_s18, %s1231_s19, %s1232_s25  }
 0x162 PF: > { %s894_s20 = sand.u32 1, %s1215_s21   ;;  %p1117_p10 = pnand %p977_p9, %p1311_p8 }
 0x163   : > { %s895_s26 = scalar_lea.sflag [#allocation4], %s894_s20 }
 0x164   : > { %p1118_p11 = pneg %p1117_p10 }
 0x166   : > { %1210 = dma.done.wait (%p1118_p11), %s895_s26, 1024  }
 0x167   : > { %1212 = vsyncadd (%p1118_p11), %s895_s26, 4294966272  ;;  %p16_p12 = scmp.ge.s32.totalorder %s1293_s27, 4   ;;  %s1663_s21 = smov %s1219_s22 }
 0x168   : > { %s1664_s22 = smov %s1223_s23  ;;  %s1665_s23 = smov %s1305_s30 }
 0x169   : > { %s1666_s24 = smov %s1293_s27  ;;  %18 = sbr.rel (!%p16_p12) target bundleno = 3 (0x3), region = 134 }
 0x16e   :  { %901 = vsyncpa [#allocation4], 1 }
 0x16f   :  { %903 = vsyncpa [#allocation4 + $0x1], 1 }

// kernel: tpu_custom_call.1
= control target key start
LH: loop header
LB: loop body
LE: loop exit
PB: predicated region body
PF: predicated region fallthrough
CT: control target
= control target key end

     0   :  { %11 = vsyncpa [#allocation4], 0  ;;  %s1654_s0 = inlined_call_operand.vmem [shape: f32[128,1], index: 0, kind: input, shape index: {}]   ;;  %s1655_s1 = inlined_call_operand.vmem [shape: bf16[128,64], index: 1, kind: input, shape index: {}]   ;;  %s1656_s2 = inlined_call_operand.vmem [shape: bf16[64,256], index: 2, kind: input, shape index: {}]   ;;  %s1657_s3 = inlined_call_operand.vmem [shape: f32[1,256], index: 3, kind: input, shape index: {}]   ;;  %s1658_s4 = inlined_call_operand.vmem [shape: f32[1,256], index: 4, kind: input, shape index: {}]   ;;  %s1659_s5 = inlined_call_operand.vmem [shape: f32[1,256], index: 5, kind: input, shape index: {}]   ;;  %s1660_s6 = inlined_call_operand.hbm [shape: bf16[128,256], index: 6, kind: output, shape index: {}]  }
   0x1   :  { %13 = vsyncpa [#allocation4 + $0x1], 0  ;;  %s1268_s21 = smov 0   ;;  %s1270_s22 = smov 0  }
   0x2   :  { %s1272_s23 = smov 0   ;;  %s1274_s24 = smov 0  }
   0x3 LB: > { %s1289_s25 = sadd.s32 4294967295, %s1227_s24   ;;  %s975_s26 = sadd.s32 4294967294, %s1227_s24   ;;  %s1227_s24 = sphi %s1274_s24, %s1666_s24   ;;  %s1223_s23 = sphi %s1272_s23, %s1665_s23   ;;  %s1219_s22 = sphi %s1270_s22, %s1664_s22   ;;  %s1215_s21 = sphi %s1268_s21, %s1663_s21  }
   0x4   : > { %s1293_s27 = sadd.s32 1, %s1227_s24   ;;  %s68_s28 = sadd.s32 1, %s1223_s23 }
   0x5   : > { %s65_s29 = ssub.s32 %s1227_s24, %s1293_s27  ;;  %p75_p0 = scmp.ne.s32.totalorder %s1223_s23, %s1219_s22 }
   0x6   : > { %p66_p1 = scmp.eq.s32.totalorder %s65_s29, 0  ;;  %p76_p2 = scmp.eq.s32.totalorder %s1227_s24, 0 }
   0x7   : > { %p183_p3 = scmp.eq.s32.totalorder %s1289_s25, 1  ;;  %p188_p4 = scmp.ne.s32.totalorder %s1219_s22, %s1215_s21 }
   0x8   : > { %s1305_s30 = scalar_select %p66_p1, %s1223_s23, %s68_s28  }
   0x9   : > { %p77_p5 = por %p76_p2, %p75_p0  ;;  %p1307_p6 = por %p183_p3, %p75_p0 }
   0xa   : > { %p189_p7 = scmp.eq.s32.totalorder %s975_s26, 1  ;;  %p977_p9 = scmp.ge.s32.totalorder %s1227_s24, 2 }
   0xc   : > { %p1311_p8 = por %p189_p7, %p188_p4  ;;  %211 = sbr.rel (%p977_p9) target bundleno = 29 (0x1d), region = 24 }
  0x11   : > { %214 = sbr.rel (!%p77_p5) target bundleno = 29 (0x1d), region = 28  ;;  %s216_s9 = sand.u32 (%p77_p5), 1, %s1223_s23  }
  0x12   : > { %s979_s10 = sshll.u32 (%p77_p5), %s1227_s24, 2  ;;  %s978_s11 = sshll.u32 (%p77_p5), %s216_s9, 5 }
  0x13   : > { %s220_s14 = scalar_lea.vmem (%p77_p5), %s1656_s2, %s979_s10  ;;  %s218_s15 = scalar_lea.vmem (%p77_p5), [#allocation2], %s978_s11 }
  0x14   : > { %v237_v0 = vld [vmem:[%s220_s14] sm:$0xf] (%p77_p5)  ;;  %v239_v1 = vld [vmem:[%s220_s14 + $0x8] sm:$0xf] (%p77_p5)  ;;  %v241_v2 = vld [vmem:[%s220_s14 + $0x10] sm:$0xf] (%p77_p5) }
  0x15   : > { %238 = vst [vmem:[%s218_s15] sm:$0xf] (%p77_p5), %v237_v0  ;;  %v243_v3 = vld [vmem:[%s220_s14 + $0x18] sm:$0xf] (%p77_p5)  ;;  %v245_v4 = vld [vmem:[%s220_s14 + $0x20] sm:$0xf] (%p77_p5) }
  0x16   : > { %240 = vst [vmem:[%s218_s15 + $0x4] sm:$0xf] %v239_v1  ;;  %v247_v5 = vld [vmem:[%s220_s14 + $0x28] sm:$0xf]  ;;  %v249_v6 = vld [vmem:[%s220_s14 + $0x30] sm:$0xf] }
  0x17   : > { %242 = vst [vmem:[%s218_s15 + $0x8] sm:$0xf] %v241_v2  ;;  %v251_v7 = vld [vmem:[%s220_s14 + $0x38] sm:$0xf] }
  0x18   : > { %244 = vst [vmem:[%s218_s15 + $0xc] sm:$0xf] %v243_v3 }
  0x19   : > { %246 = vst [vmem:[%s218_s15 + $0x10] sm:$0xf] %v245_v4 }
  0x1a   : > { %248 = vst [vmem:[%s218_s15 + $0x14] sm:$0xf] %v247_v5 }
  0x1b   : > { %250 = vst [vmem:[%s218_s15 + $0x18] sm:$0xf] %v249_v6 }
  0x1c   : > { %252 = vst [vmem:[%s218_s15 + $0x1c] sm:$0xf] %v251_v7 }
  0x1d PF: > { %p980_p10 = scmp.ge.s32.totalorder %s1227_s24, 1  ;;  %p309_p11 = scmp.lt.s32.totalorder %s1227_s24, 3 }
  0x1f   : > { %p310_p12 = pnand %p980_p10, %p309_p11 }
  0x20   : > { %s1329_s18 = sand.u32 (!%p310_p12), 1, %s1219_s22   ;;  %p354_p13 = scmp.lt.s32.totalorder (!%p310_p12), %s1289_s25, 1 }
  0x21   : > { %313 = sbr.rel (%p310_p12) target bundleno = 354 (0x162), region = 81  ;;  %s981_s26 = sshll.u32 (!%p310_p12), %s1329_s18, 5 }
  0x22   : > { %s318_s28 = scalar_lea.vmem (!%p310_p12), [#allocation2], %s981_s26  ;;  %s1040_s19 = sshll.u32 (!%p310_p12), %s1289_s25, 2 }
  0x23   : > { %s876_s26 = scalar_lea.hbm (!%p310_p12), %s1660_s6, %s1040_s19  ;;  %s1185_s15 = scalar_lea.hbm (!%p310_p12), %s1660_s6, 128 }
  0x26   : > { %v364_v8 = vld [vmem:[%s1654_s0] sm:$0xff]  ;;  %v366_v9 = vld [vmem:[%s1654_s0 + $0x10] sm:$0xff]  ;;  %v1229_v10 = vmov 0   ;;  %v1054_v11 = vld [vmem:[%s318_s28 + $0x18] sm:$0xff]  ;;  %s1349_s16 = scalar_select %p354_p13, %s1289_s25, 1  ;;  %vm472_vm0 = vcmask 523264  }
  0x27   : > { %1157 = vset.pattern.permute.xlu0 %v1229_v10  ;;  %1158 = vset.pattern.permute.xlu1 %v1229_v10  ;;  %v1053_v12 = vld [vmem:[%s318_s28 + $0x10] sm:$0xff]  ;;  %v365_v13 = vld [vmem:[%s1654_s0 + $0x8] sm:$0xff]  ;;  %v368_v14 = vld [vmem:[%s1654_s0 + $0x20] sm:$0xff] }
  0x28   : > { %548 = vperm.xlu0 %1157, %v364_v8   ;;  %558 = vperm.xlu1 %1158, %v366_v9   ;;  %v367_v15 = vld [vmem:[%s1654_s0 + $0x18] sm:$0xff]  ;;  %v1052_v16 = vld [vmem:[%s318_s28 + $0x8] sm:$0xff]  ;;  %v1051_v17 = vld [vmem:[%s318_s28] sm:$0xff]  ;;  %s356_s13 = scalar_lea.vmem %s1657_s3, %s1349_s16  ;;  %s359_s29 = scalar_lea.vmem %s1658_s4, %s1349_s16 }
  0x29   : > { %1159 = vset.pattern.permute.xlu2 %v1229_v10  ;;  %501 = vmatpush.bf16.msra.mxu0 %v1054_v11  ;;  %v369_v18 = vld [vmem:[%s1654_s0 + $0x28] sm:$0xff]  ;;  %v370_v19 = vld [vmem:[%s1654_s0 + $0x30] sm:$0xff]  ;;  %v1043_v20 = vld [vmem:[%s1655_s1] sm:$0xff]  ;;  %s362_s10 = scalar_lea.vmem %s1659_s5, %s1349_s16  ;;  %s982_s16 = sshll.u32 %s1329_s18, 6 }
  0x2a   : > { %1102 = vmatpush.bf16.msra.mxu1 %v1054_v11  ;;  %1103 = vmatpush.bf16.msra.mxu2 %v1054_v11  ;;  %v1045_v21 = vld [vmem:[%s1655_s1 + $0x10] sm:$0xff]  ;;  %v371_v22 = vld [vmem:[%s1654_s0 + $0x38] sm:$0xff]  ;;  %v1047_v23 = vld [vmem:[%s1655_s1 + $0x20] sm:$0xff]  ;;  %s879_s28 = sshll.u32 %s876_s26, 4  ;;  %s880_s28 = int_to_ptr.hbm [resolvable:$true] %s879_s28 }
  0x2b   : > { %1104 = vmatpush.bf16.msra.mxu3 %v1054_v11  ;;  %568 = vperm.xlu2 %1159, %v368_v14   ;;  %v1049_v24 = vld [vmem:[%s1655_s1 + $0x30] sm:$0xff]  ;;  %v372_v25 = vld [vmem:[%s1654_s0 + $0x40] sm:$0xff]  ;;  %v373_v26 = vld [vmem:[%s1654_s0 + $0x48] sm:$0xff]  ;;  %s1179_s11 = sshra.s32 %s880_s28, 4  ;;  %s1180_s11 = int_to_ptr.hbm [resolvable:$true] %s1179_s11 }
  0x2c   : > { %v374_v27 = vld [vmem:[%s1654_s0 + $0x50] sm:$0xff]  ;;  %v375_v28 = vld [vmem:[%s1654_s0 + $0x58] sm:$0xff]  ;;  %v376_v29 = vld [vmem:[%s1654_s0 + $0x60] sm:$0xff]  ;;  %s1181_s12 = scalar_lea.hbm %s1180_s11, 64  ;;  %p1186_p3 = scmp.lt.s32.totalorder %s1180_s11, %s1660_s6 }
  0x2d   : > { %502 = vmatpush.bf16.msra.mxu0 %v1053_v12  ;;  %v1044_v30 = vld [vmem:[%s1655_s1 + $0x8] sm:$0xff]  ;;  %v1046_v31 = vld [vmem:[%s1655_s1 + $0x18] sm:$0xff]  ;;  %v378_v35 = vld [vmem:[%s1654_s0 + $0x70] sm:$0xff]  ;;  %p1182_p0 = scmp.ne.s32.totalorder %s1180_s11, %s1181_s12  ;;  %p1187_p4 = scmp.lt.s32.totalorder %s1185_s15, %s1181_s12 }
  0x2e   : > { %1105 = vmatpush.bf16.msra.mxu1 %v1053_v12  ;;  %1106 = vmatpush.bf16.msra.mxu2 %v1053_v12  ;;  %v377_v32 = vld [vmem:[%s1654_s0 + $0x68] sm:$0xff]  ;;  %v1050_v34 = vld [vmem:[%s1655_s1 + $0x38] sm:$0xff]  ;;  %v1160_v48 = vld [vmem:[%s356_s13] ss:$0 sm:$0xff] }
  0x2f   : > { %1107 = vmatpush.bf16.msra.mxu3 %v1053_v12  ;;  %v1048_v33 = vld [vmem:[%s1655_s1 + $0x28] sm:$0xff]  ;;  %v379_v36 = vld [vmem:[%s1654_s0 + $0x78] sm:$0xff]  ;;  %p1183_p1 = pnand %p1182_p0, %p1307_p6  ;;  %p1188_p5 = por %p1187_p4, %p1186_p3 }
  0x30   : > { %553 = vperm.xlu0 %1157, %v365_v13   ;;  %563 = vperm.xlu1 %1158, %v367_v15  }
  0x31   : > { %503 = vmatpush.bf16.msra.mxu0 %v1052_v16  ;;  %p1184_p2 = pneg %p1183_p1 }
  0x32   : > { %1108 = vmatpush.bf16.msra.mxu1 %v1052_v16  ;;  %1109 = vmatpush.bf16.msra.mxu2 %v1052_v16 }
  0x33   : > { %1110 = vmatpush.bf16.msra.mxu3 %v1052_v16  ;;  %573 = vperm.xlu2 %1159, %v369_v18   ;;  %p1189_p7 = pnand %p1188_p5, %p1184_p2 }
  0x35   : > { %504 = vmatpush.bf16.msra.mxu0 %v1051_v17 }
  0x36   : > { %1111 = vmatpush.bf16.msra.mxu1 %v1051_v17  ;;  %1112 = vmatpush.bf16.msra.mxu2 %v1051_v17 }
  0x37   : > { %1113 = vmatpush.bf16.msra.mxu3 %v1051_v17 }
  0x38   : > { %578 = vperm.xlu0 %1157, %v370_v19   ;;  %583 = vperm.xlu1 %1158, %v371_v22  }
  0x39   : > { %1031 = vmatmul.msk.bf16.vlgmr.msra.gmra.mxu0 %vm472_vm0, %v1043_v20  ;;  %1033 = vmatmul.msk.bf16.vlgmr.msra.gmra.mxu1 %vm472_vm0, %v1045_v21 }
  0x3a   : > { %1035 = vmatmul.msk.bf16.vlgmr.msra.gmra.mxu2 %vm472_vm0, %v1047_v23  ;;  %1037 = vmatmul.msk.bf16.vlgmr.msra.gmra.mxu3 %vm472_vm0, %v1049_v24 }
  0x3b   : > { %588 = vperm.xlu2 %1159, %v372_v25  }
  0x40   : > { %593 = vperm.xlu0 %1157, %v373_v26   ;;  %598 = vperm.xlu1 %1158, %v374_v27  }
  0x43   : > { %603 = vperm.xlu2 %1159, %v375_v28  }
  0x48   : > { %608 = vperm.xlu0 %1157, %v376_v29   ;;  %613 = vperm.xlu1 %1158, %v377_v32  }
  0x49   : > { %1032 = vmatmul.msk.bf16.gmra.mxu0 %vm472_vm0, %v1044_v30  ;;  %1034 = vmatmul.msk.bf16.gmra.mxu1 %vm472_vm0, %v1046_v31 }
  0x4a   : > { %1036 = vmatmul.msk.bf16.gmra.mxu2 %vm472_vm0, %v1048_v33  ;;  %1038 = vmatmul.msk.bf16.gmra.mxu3 %vm472_vm0, %v1050_v34 }
  0x4b   : > { %618 = vperm.xlu2 %1159, %v378_v35  }
  0x50   : > { %623 = vperm.xlu0 %1157, %v379_v36  }
  0x85   : > { %v1429_v42 = vpop.permute.xlu2 %568 }
  0x8d   : > { %v1442_v52 = vpop.permute.xlu2 %573 }
  0x95   : > { %v1466_v6 = vpop.permute.xlu2 %588 }
  0x9a   : > { %v1425_v37 = vpop.permute.xlu0 %548  ;;  %v1427_v40 = vpop.permute.xlu1 %558 }
  0x9d   : > { %v1489_v27 = vpop.permute.xlu2 %603 }
  0xa2   : > { %v1431_v45 = vpop.permute.xlu0 %553  ;;  %v1433_v47 = vpop.permute.xlu1 %563 }
  0xaa   : > { %v1448_v56 = vpop.permute.xlu0 %578  ;;  %v1460_v1 = vpop.permute.xlu1 %583 }
  0xb2   : > { %v1472_v11 = vpop.permute.xlu0 %593  ;;  %v1483_v22 = vpop.permute.xlu1 %598 }
  0xb6   : > { %v506_v38 = vpop.f32.mrf.mxu0  ;;  %v516_v39 = vpop.f32.mrf.mxu1 }
  0xb7   : > { %v1444_v54 = vadd.f32 %v1160_v48, %v506_v38  ;;  %v1456_v62 = vadd.f32 %v1160_v48, %v516_v39 }
  0xb9   : > { %v626_v58 = vmul.f32 %v1425_v37, %v1444_v54  ;;  %v630_v8 = vmul.f32 %v1429_v42, %v1456_v62 }
  0xba   : > { %v1493_v31 = vpop.permute.xlu0 %608 }
  0xbd   : > { %v526_v41 = vpop.f32.mrf.mxu2  ;;  %v536_v46 = vpop.f32.mrf.mxu3 }
  0xbe   : > { %v508_v43 = vpop.f32.mrf.mxu0  ;;  %v518_v44 = vpop.f32.mrf.mxu1  ;;  %v1476_v15 = vadd.f32 %v1160_v48, %v526_v41  ;;  %v1495_v32 = vadd.f32 %v1160_v48, %v536_v46 }
  0xbf   : > { %v1440_v51 = vadd.f32 %v1160_v48, %v508_v43  ;;  %v1462_v3 = vadd.f32 %v1160_v48, %v518_v44 }
  0xc0   : > { %v634_v24 = vmul.f32 %v1466_v6, %v1476_v15  ;;  %v638_v41 = vmul.f32 %v1493_v31, %v1495_v32 }
  0xc1   : > { %v627_v57 = vmul.f32 %v1431_v45, %v1440_v51  ;;  %v631_v12 = vmul.f32 %v1442_v52, %v1462_v3 }
  0xc3   : > { %v642_v63 = vadd.f32 %v627_v57, %v626_v58  ;;  %v1512_v57 = vpop.permute.xlu2 %618 }
  0xc5   : > { %v528_v49 = vpop.f32.mrf.mxu2  ;;  %v538_v60 = vpop.f32.mrf.mxu3 }
  0xc6   : > { %v511_v50 = vpop.f32.mrf.mxu0  ;;  %v521_v53 = vpop.f32.mrf.mxu1  ;;  %v1480_v19 = vadd.f32 %v1160_v48, %v528_v49  ;;  %v1499_v35 = vadd.f32 %v1160_v48, %v538_v60 }
  0xc7   : > { %v1446_v55 = vadd.f32 %v1160_v48, %v511_v50  ;;  %v1470_v9 = vadd.f32 %v1160_v48, %v521_v53  ;;  %v1506_v49 = vpop.permute.xlu1 %613  ;;  %v1516_v60 = vpop.permute.xlu0 %623 }
  0xc8   : > { %v635_v28 = vmul.f32 %v1472_v11, %v1480_v19  ;;  %v639_v46 = vmul.f32 %v1506_v49, %v1499_v35 }
  0xc9   : > { %v628_v59 = vmul.f32 %v1427_v40, %v1446_v55  ;;  %v632_v16 = vmul.f32 %v1448_v56, %v1470_v9 }
  0xcb   : > { %v643_v4 = vadd.f32 %v642_v63, %v628_v59 }
  0xcd   : > { %v531_v2 = vpop.f32.mrf.mxu2  ;;  %v541_v18 = vpop.f32.mrf.mxu3 }
  0xce   : > { %v513_v61 = vpop.f32.mrf.mxu0  ;;  %v523_v7 = vpop.f32.mrf.mxu1  ;;  %v1487_v25 = vadd.f32 %v1160_v48, %v531_v2  ;;  %v1504_v43 = vadd.f32 %v1160_v48, %v541_v18 }
  0xcf   : > { %v1458_v0 = vadd.f32 %v1160_v48, %v513_v61  ;;  %v524_v14 = vadd.f32 %v1160_v48, %v523_v7 }
  0xd0   : > { %v636_v33 = vmul.f32 %v1483_v22, %v1487_v25  ;;  %v640_v58 = vmul.f32 %v1512_v57, %v1504_v43 }
  0xd1   : > { %v629_v5 = vmul.f32 %v1433_v47, %v1458_v0  ;;  %v633_v20 = vmul.f32 %v1460_v1, %v524_v14 }
  0xd3   : > { %v644_v10 = vadd.f32 %v643_v4, %v629_v5 }
  0xd5   : > { %v645_v13 = vadd.f32 %v644_v10, %v630_v8  ;;  %v533_v23 = vpop.f32.mrf.mxu2  ;;  %v543_v39 = vpop.f32.mrf.mxu3 }
  0xd6   : > { %v534_v30 = vadd.f32 %v1160_v48, %v533_v23  ;;  %v1510_v53 = vadd.f32 %v1160_v48, %v543_v39 }
  0xd7   : > { %v646_v17 = vadd.f32 %v645_v13, %v631_v12 }
  0xd8   : > { %v637_v36 = vmul.f32 %v1489_v27, %v534_v30  ;;  %v641_v61 = vmul.f32 %v1516_v60, %v1510_v53 }
  0xd9   : > { %v647_v21 = vadd.f32 %v646_v17, %v632_v16 }
  0xdb   : > { %v648_v26 = vadd.f32 %v647_v21, %v633_v20 }
  0xdd   : > { %v649_v29 = vadd.f32 %v648_v26, %v634_v24 }
  0xdf   : > { %v650_v34 = vadd.f32 %v649_v29, %v635_v28 }
  0xe1   : > { %v651_v38 = vadd.f32 %v650_v34, %v636_v33 }
  0xe3   : > { %v652_v44 = vadd.f32 %v651_v38, %v637_v36 }
  0xe5   : > { %v653_v50 = vadd.f32 %v652_v44, %v638_v41 }
  0xe7   : > { %v654_v59 = vadd.f32 %v653_v50, %v639_v46 }
  0xe9   : > { %v655_v63 = vadd.f32 %v654_v59, %v640_v58 }
  0xeb   : > { %v656_v2 = vadd.f32 %v655_v63, %v641_v61 }
  0xed   : > { %v657_v4 = vrot.slane %v656_v2, 4 }
  0xef   : > { %v658_v5 = vadd.f32 %v657_v4, %v656_v2 }
  0xf1   : > { %v659_v7 = vrot.slane %v658_v5, 2 }
  0xf3   : > { %v660_v8 = vadd.f32 %v659_v7, %v658_v5 }
  0xf5   : > { %v661_v10 = vrot.slane %v660_v8, 1 }
  0xf7   : > { %v662_v48 = vadd.f32 %v661_v10, %v660_v8 }
  0xf9   : > { %v663_v12 = vmul.f32 0.125, %v662_v48 }
  0xfb   : > { %v1521_v13 = vsub.f32 %v1444_v54, %v663_v12  ;;  %v1524_v16 = vsub.f32 %v1440_v51, %v663_v12  ;;  %v1527_v17 = vsub.f32 %v1446_v55, %v663_v12  ;;  %v1534_v21 = vsub.f32 %v1458_v0, %v663_v12 }
  0xfc   : > { %v1537_v23 = vsub.f32 %v1456_v62, %v663_v12  ;;  %v1542_v55 = vsub.f32 %v1462_v3, %v663_v12  ;;  %v1547_v28 = vsub.f32 %v1470_v9, %v663_v12  ;;  %v1551_v33 = vsub.f32 %v524_v14, %v663_v12 }
  0xfd   : > { %v680_v18 = vmul.f32 %v1521_v13, %v1425_v37  ;;  %v681_v20 = vmul.f32 %v1524_v16, %v1431_v45  ;;  %v682_v54 = vmul.f32 %v1527_v17, %v1427_v40  ;;  %v683_v26 = vmul.f32 %v1534_v21, %v1433_v47 }
  0xfe   : > { %v684_v0 = vmul.f32 %v1537_v23, %v1429_v42  ;;  %v685_v34 = vmul.f32 %v1542_v55, %v1442_v52  ;;  %v1556_v3 = vsub.f32 %v1476_v15, %v663_v12  ;;  %v686_v39 = vmul.f32 %v1547_v28, %v1448_v56 }
  0xff   : > { %v696_v51 = vmul.f32 %v680_v18, %v680_v18  ;;  %v697_v24 = vmul.f32 %v681_v20, %v681_v20  ;;  %v698_v29 = vmul.f32 %v682_v54, %v682_v54  ;;  %v699_v36 = vmul.f32 %v683_v26, %v683_v26 }
 0x100   : > { %v700_v9 = vmul.f32 %v684_v0, %v684_v0  ;;  %v1561_v44 = vsub.f32 %v1480_v19, %v663_v12  ;;  %v687_v14 = vmul.f32 %v1551_v33, %v1460_v1  ;;  %v701_v46 = vmul.f32 %v685_v34, %v685_v34 }
 0x101   : > { %v712_v62 = vadd.f32 %v697_v24, %v696_v51  ;;  %v1566_v58 = vsub.f32 %v1487_v25, %v663_v12  ;;  %v688_v15 = vmul.f32 %v1556_v3, %v1466_v6  ;;  %v702_v59 = vmul.f32 %v686_v39, %v686_v39 }
 0x102   : > { %v675_v63 = vsub.f32 %v534_v30, %v663_v12  ;;  %v689_v2 = vmul.f32 %v1561_v44, %v1472_v11  ;;  %v703_v4 = vmul.f32 %v687_v14, %v687_v14  ;;  %v676_v5 = vsub.f32 %v1495_v32, %v663_v12 }
 0x103   : > { %v713_v38 = vadd.f32 %v712_v62, %v698_v29  ;;  %v690_v7 = vmul.f32 %v1566_v58, %v1483_v22  ;;  %v704_v8 = vmul.f32 %v688_v15, %v688_v15  ;;  %v677_v25 = vsub.f32 %v1499_v35, %v663_v12 }
 0x104   : > { %v691_v48 = vmul.f32 %v675_v63, %v1489_v27  ;;  %v705_v18 = vmul.f32 %v689_v2, %v689_v2  ;;  %v678_v30 = vsub.f32 %v1504_v43, %v663_v12  ;;  %v692_v54 = vmul.f32 %v676_v5, %v1493_v31 }
 0x105   : > { %v714_v41 = vadd.f32 %v713_v38, %v699_v36  ;;  %v706_v51 = vmul.f32 %v690_v7, %v690_v7  ;;  %v679_v26 = vsub.f32 %v1510_v53, %v663_v12  ;;  %v693_v32 = vmul.f32 %v677_v25, %v1506_v49 }
 0x106   : > { %v707_v0 = vmul.f32 %v691_v48, %v691_v48  ;;  %v694_v62 = vmul.f32 %v678_v30, %v1512_v57  ;;  %v708_v34 = vmul.f32 %v692_v54, %v692_v54 }
 0x107   : > { %v715_v50 = vadd.f32 %v714_v41, %v700_v9  ;;  %v695_v36 = vmul.f32 %v679_v26, %v1516_v60  ;;  %v709_v38 = vmul.f32 %v693_v32, %v693_v32 }
 0x108   : > { %v710_v9 = vmul.f32 %v694_v62, %v694_v62 }
 0x109   : > { %v716_v61 = vadd.f32 %v715_v50, %v701_v46  ;;  %v711_v41 = vmul.f32 %v695_v36, %v695_v36 }
 0x10b   : > { %v717_v19 = vadd.f32 %v716_v61, %v702_v59 }
 0x10d   : > { %v718_v10 = vadd.f32 %v717_v19, %v703_v4 }
 0x10f   : > { %v719_v20 = vadd.f32 %v718_v10, %v704_v8 }
 0x111   : > { %v720_v24 = vadd.f32 %v719_v20, %v705_v18 }
 0x113   : > { %v721_v29 = vadd.f32 %v720_v24, %v706_v51  ;;  %v1161_v24 = vld [vmem:[%s359_s29] ss:$0 sm:$0xff]  ;;  %s353_s29 = scalar_lea.vmem [#allocation3], %s982_s16 }
 0x114   : > { %s877_s9 = sshll.u32 %s353_s29, 4  ;;  %s878_s9 = int_to_ptr.vmem [resolvable:$true] %s877_s9 }
 0x115   : > { %v722_v35 = vadd.f32 %v721_v29, %v707_v0 }
 0x117   : > { %v723_v39 = vadd.f32 %v722_v35, %v708_v34 }
 0x119   : > { %v724_v43 = vadd.f32 %v723_v39, %v709_v38 }
 0x11b   : > { %v725_v14 = vadd.f32 %v724_v43, %v710_v9 }
 0x11d   : > { %v726_v46 = vadd.f32 %v725_v14, %v711_v41 }
 0x11f   : > { %v727_v50 = vrot.slane %v726_v46, 4 }
 0x121   : > { %v728_v15 = vadd.f32 %v727_v50, %v726_v46 }
 0x123   : > { %v729_v53 = vrot.slane %v728_v15, 2 }
 0x125   : > { %v730_v12 = vadd.f32 %v729_v53, %v728_v15 }
 0x127   : > { %v731_v59 = vrot.slane %v730_v12, 1 }
 0x129   : > { %v732_v61 = vadd.f32 %v731_v59, %v730_v12 }
 0x12b   : > { %v733_v2 = vmul.f32 0.125, %v732_v61 }
 0x12d   : > { %v734_v4 = vadd.f32 1e-05, %v733_v2 }
 0x12f   : > { %1163 = vrsqrt.f32 %v734_v4  ;;  %vm741_vm2 = vweird.f32 %v734_v4 }
 0x135   : > { %v1164_v19 = vpop.eup %1163 }
 0x136   : > { %v736_v7 = vmul.f32 %v1164_v19, %v734_v4  ;;  %vm742_vm1 = vweird.f32 %v1164_v19 }
 0x137   : > { %vm743_vm3 = vmor %vm741_vm2, %vm742_vm1 }
 0x138   : > { %v737_v8 = vmul.f32 %v1164_v19, %v736_v7 }
 0x13a   : > { %v738_v10 = vmul.f32 0.5, %v737_v8 }
 0x13c   : > { %v739_v48 = vsub.f32 1.5, %v738_v10 }
 0x13e   : > { %v740_v18 = vmul.f32 %v1164_v19, %v739_v48 }
 0x140   : > { %v744_v20 = vsel %vm743_vm3, %v1164_v19, %v740_v18 }
 0x141   : > { %v747_v54 = vmul.f32 %v744_v20, %v1527_v17  ;;  %v748_v51 = vmul.f32 %v744_v20, %v1534_v21  ;;  %v749_v32 = vmul.f32 %v744_v20, %v1537_v23  ;;  %v750_v0 = vmul.f32 %v744_v20, %v1542_v55 }
 0x142   : > { %v751_v29 = vmul.f32 %v744_v20, %v1547_v28  ;;  %v752_v62 = vmul.f32 %v744_v20, %v1551_v33  ;;  %v753_v34 = vmul.f32 %v744_v20, %v1556_v3  ;;  %v754_v17 = vmul.f32 %v744_v20, %v1561_v44  ;;  %v1162_v28 = vld [vmem:[%s362_s10] ss:$0 sm:$0xff]  ;;  %s866_s10 = scalar_lea.sflag [#allocation4], %s1329_s18 }
 0x143   : > { %v755_v21 = vmul.f32 %v744_v20, %v1566_v58  ;;  %v756_v35 = vmul.f32 %v744_v20, %v675_v63  ;;  %v745_v36 = vmul.f32 %v744_v20, %v1521_v13  ;;  %v757_v38 = vmul.f32 %v744_v20, %v676_v5 }
 0x144   : > { %v758_v39 = vmul.f32 %v744_v20, %v677_v25  ;;  %v759_v9 = vmul.f32 %v744_v20, %v678_v30  ;;  %v746_v23 = vmul.f32 %v744_v20, %v1524_v16  ;;  %v760_v43 = vmul.f32 %v744_v20, %v679_v26 }
 0x145   : > { %v767_v55 = vmul.f32 %v1161_v24, %v747_v54  ;;  %v768_v41 = vmul.f32 %v1161_v24, %v748_v51  ;;  %v769_v33 = vmul.f32 %v1161_v24, %v749_v32  ;;  %v770_v3 = vmul.f32 %v1161_v24, %v750_v0 }
 0x146   : > { %v771_v44 = vmul.f32 %v1161_v24, %v751_v29  ;;  %v772_v58 = vmul.f32 %v1161_v24, %v752_v62  ;;  %v773_v63 = vmul.f32 %v1161_v24, %v753_v34  ;;  %v774_v14 = vmul.f32 %v1161_v24, %v754_v17 }
 0x147   : > { %v775_v13 = vmul.f32 %v1161_v24, %v755_v21  ;;  %v776_v5 = vmul.f32 %v1161_v24, %v756_v35  ;;  %v765_v25 = vmul.f32 %v1161_v24, %v745_v36  ;;  %v777_v30 = vmul.f32 %v1161_v24, %v757_v38 }
 0x148   : > { %v778_v46 = vmul.f32 %v1161_v24, %v758_v39  ;;  %v779_v16 = vmul.f32 %v1161_v24, %v759_v9  ;;  %v766_v26 = vmul.f32 %v1161_v24, %v746_v23  ;;  %v780_v50 = vmul.f32 %v1161_v24, %v760_v43 }
 0x149   : > { %v787_v15 = vadd.f32 %v1162_v28, %v767_v55  ;;  %v788_v53 = vadd.f32 %v1162_v28, %v768_v41  ;;  %v789_v12 = vadd.f32 %v1162_v28, %v769_v33  ;;  %v790_v59 = vadd.f32 %v1162_v28, %v770_v3 }
 0x14a   : > { %v791_v61 = vadd.f32 %v1162_v28, %v771_v44  ;;  %v792_v2 = vadd.f32 %v1162_v28, %v772_v58  ;;  %v793_v4 = vadd.f32 %v1162_v28, %v773_v63  ;;  %v794_v19 = vadd.f32 %v1162_v28, %v774_v14 }
 0x14b   : > { %v795_v7 = vadd.f32 %v1162_v28, %v775_v13  ;;  %v796_v8 = vadd.f32 %v1162_v28, %v776_v5  ;;  %v785_v10 = vadd.f32 %v1162_v28, %v765_v25  ;;  %v797_v48 = vadd.f32 %v1162_v28, %v777_v30 }
 0x14c   : > { %v798_v18 = vadd.f32 %v1162_v28, %v778_v46  ;;  %v799_v20 = vadd.f32 %v1162_v28, %v779_v16  ;;  %v786_v54 = vadd.f32 %v1162_v28, %v766_v26  ;;  %v800_v51 = vadd.f32 %v1162_v28, %v780_v50 }
 0x14d   : > { %v803_v32 = vmax.f32 %v787_v15, 0.0  ;;  %v804_v0 = vmax.f32 %v788_v53, 0.0  ;;  %v805_v24 = vmax.f32 %v789_v12, 0.0  ;;  %v806_v29 = vmax.f32 %v790_v59, 0.0 }
 0x14e   : > { %v807_v62 = vmax.f32 %v791_v61, 0.0  ;;  %v808_v34 = vmax.f32 %v792_v2, 0.0  ;;  %v809_v17 = vmax.f32 %v793_v4, 0.0  ;;  %v810_v21 = vmax.f32 %v794_v19, 0.0 }
 0x14f   : > { %v811_v35 = vmax.f32 %v795_v7, 0.0  ;;  %v812_v36 = vmax.f32 %v796_v8, 0.0  ;;  %v801_v38 = vmax.f32 %v785_v10, 0.0  ;;  %v813_v39 = vmax.f32 %v797_v48, 0.0 }
 0x150   : > { %v814_v9 = vmax.f32 %v798_v18, 0.0  ;;  %v815_v23 = vmax.f32 %v799_v20, 0.0  ;;  %v802_v43 = vmax.f32 %v786_v54, 0.0  ;;  %v816_v55 = vmax.f32 %v800_v51, 0.0 }
 0x151   : > { %v819_v41 = vmul.f32 %v803_v32, %v1427_v40  ;;  %v820_v28 = vmul.f32 %v804_v0, %v1433_v47  ;;  %v821_v33 = vmul.f32 %v805_v24, %v1429_v42  ;;  %v822_v3 = vmul.f32 %v806_v29, %v1442_v52 }
 0x152   : > { %v823_v44 = vmul.f32 %v807_v62, %v1448_v56  ;;  %v824_v58 = vmul.f32 %v808_v34, %v1460_v1  ;;  %v825_v63 = vmul.f32 %v809_v17, %v1466_v6  ;;  %v826_v14 = vmul.f32 %v810_v21, %v1472_v11 }
 0x153   : > { %v827_v13 = vmul.f32 %v811_v35, %v1483_v22  ;;  %v828_v5 = vmul.f32 %v812_v36, %v1489_v27  ;;  %v829_v40 = vmul.f32 %v813_v39, %v1493_v31  ;;  %v830_v47 = vmul.f32 %v814_v9, %v1506_v49 }
 0x154   : > { %v831_v42 = vmul.f32 %v815_v23, %v1512_v57  ;;  %v832_v52 = vmul.f32 %v816_v55, %v1516_v60  ;;  %v1063_v56 = vpack.c.bf16 %v820_v28, %v819_v41  ;;  %v1068_v25 = vpack.c.bf16 %v822_v3, %v821_v33 }
 0x155   : > { %v1073_v1 = vpack.c.bf16 %v824_v58, %v823_v44  ;;  %v817_v6 = vmul.f32 %v801_v38, %v1425_v37  ;;  %v818_v11 = vmul.f32 %v802_v43, %v1431_v45  ;;  %v1078_v22 = vpack.c.bf16 %v826_v14, %v825_v63 }
 0x156   : > { %1095 = vst [vmem:[%s353_s29 + $0x8] sm:$0xff] %v1063_v56   ;;  %v1083_v27 = vpack.c.bf16 %v828_v5, %v827_v13  ;;  %v1088_v31 = vpack.c.bf16 %v830_v47, %v829_v40  ;;  %v1093_v49 = vpack.c.bf16 %v832_v52, %v831_v42 }
 0x157   : > { %1096 = vst [vmem:[%s353_s29 + $0x10] sm:$0xff] %v1068_v25   ;;  %v1058_v57 = vpack.c.bf16 %v818_v11, %v817_v6 }
 0x158   : > { %1097 = vst [vmem:[%s353_s29 + $0x18] sm:$0xff] %v1073_v1  }
 0x159   : > { %1098 = vst [vmem:[%s353_s29 + $0x20] sm:$0xff] %v1078_v22  }
 0x15a   : > { %1099 = vst [vmem:[%s353_s29 + $0x28] sm:$0xff] %v1083_v27  }
 0x15b   : > { %1100 = vst [vmem:[%s353_s29 + $0x30] sm:$0xff] %v1088_v31  }
 0x15c   : > { %1101 = vst [vmem:[%s353_s29 + $0x38] sm:$0xff] %v1093_v49  }
 0x15d   : > { %1059 = vst [vmem:[%s353_s29] sm:$0xff] %v1058_v57  }
 0x15e   : > { %1192 = shalt.err (!%p1189_p7)
}
 0x15f   : > { %s1230_s18 = smov 64   ;;  %s1231_s19 = smov 128  }
 0x160   : > { %s1232_s25 = smov 4  }
 0x161   : > { %1114 = dma.vmem_to_hbm [thread:$0]  (%p1307_p6), %s878_s9, 1024, %s880_s28, %s866_s10, %s1230_s18, %s1231_s19, %s1232_s25  }
 0x162 PF: > { %s894_s20 = sand.u32 1, %s1215_s21   ;;  %p1117_p10 = pnand %p977_p9, %p1311_p8 }
 0x163   : > { %s895_s26 = scalar_lea.sflag [#allocation4], %s894_s20 }
 0x164   : > { %p1118_p11 = pneg %p1117_p10 }
 0x166   : > { %1210 = dma.done.wait (%p1118_p11), %s895_s26, 1024  }
 0x167   : > { %1212 = vsyncadd (%p1118_p11), %s895_s26, 4294966272  ;;  %p16_p12 = scmp.ge.s32.totalorder %s1293_s27, 4   ;;  %s1663_s21 = smov %s1219_s22 }
 0x168   : > { %s1664_s22 = smov %s1223_s23  ;;  %s1665_s23 = smov %s1305_s30 }
 0x169   : > { %s1666_s24 = smov %s1293_s27  ;;  %18 = sbr.rel (!%p16_p12) target bundleno = 3 (0x3), region = 134 }
 0x16e   :  { %901 = vsyncpa [#allocation4], 1 }
 0x16f   :  { %903 = vsyncpa [#allocation4 + $0x1], 1 }

</bundles_post_ra>
